<compile_context>
chip_gen: v5e
topology: v5e:2x2
jax: 0.10.0
libtpu: 0.0.40
codegen_flags: <defaults>
</compile_context>

<pallas_src>
import functools

import jax
import jax.numpy as jnp
from jax.experimental import pallas as pl
from jax.experimental.pallas import tpu as pltpu


# ---------------------------------------------------------------------------
# Fused Pallas kernel
# ---------------------------------------------------------------------------

def fused_forward_kernel(x_ref, a_ref, p_ref, w_ref, b_ref, o_ref,
                         *, plan, k, alpha):
    """Entire entpoolGNN forward in one kernel invocation.

    x_ref : [NP, HP]        f32   padded node features (NP=32, HP=32)
    a_ref : [k, NP, NP]     bf16  (I + A_edge^T), then mask-folded (I + A_pool_i^T)
    p_ref : [k, GP, NP]     bf16  one-hot(batch) pool matrices with layer_mask
                                  folded in (entries are exact 0/1)
    w_ref : [NW, HP, HP]    bf16  all Linear weights (BN folded), de-padded
    b_ref : [NB, 1, HP]     f32   all Linear biases  (BN folded)
    o_ref : [GP, HP]        f32   padded logits
    """
    f32 = jnp.float32
    bf16 = jnp.bfloat16

    def matmul(h_bf, w_idx):
        # bf16 MXU inputs, f32 accumulation.
        return jnp.dot(h_bf, w_ref[w_idx], preferred_element_type=f32)

    def block(h_bf, a, bplan):
        # GIN convs; the JumpingKnowledge('cat') + Linear is evaluated as an
        # interleaved sum of per-layer matmuls: acc is updated right after
        # each conv so only (cur_bf, acc) stay live (no JK spill) and only
        # the last JK matmul is on the critical dependent-matmul chain.
        acc = None
        cur_bf = h_bf
        for conv, w_jk in zip(bplan["convs"], bplan["jk_w"]):
            w1, b1, w2, b2 = conv
            # GINConv(eps=0): nn((I + A^T) @ x); BN folded into each Linear.
            agg_bf = jnp.dot(a, cur_bf, preferred_element_type=f32).astype(bf16)
            z_bf = jnp.maximum(matmul(agg_bf, w1) + b_ref[b1], 0.0).astype(bf16)
            cur_bf = jnp.maximum(matmul(z_bf, w2) + b_ref[b2], 0.0).astype(bf16)
            t = matmul(cur_bf, w_jk)
            acc = t if acc is None else acc + t
        return acc + b_ref[bplan["jk_b"]]

    # Hoisted bf16 casts: each activation is cast once and reused everywhere.
    h_bf = x_ref[...].astype(bf16)
    a_main = a_ref[0]                       # original edge_index aggregation
    pooled = None
    for i in range(k):
        # x = relu(embed_block_i(x, edge_index))  (always the original edges)
        h_bf = jnp.maximum(block(h_bf, a_main, plan["embed"][i]),
                           0.0).astype(bf16)
        # xs_i = global_add_pool(x * mask_i, batch); mask_i folded into
        # p_ref[i] (exact 0/1 in bf16); alpha_i applied here in f32.
        contrib = alpha[i] * jnp.dot(p_ref[i], h_bf, preferred_element_type=f32)
        pooled = contrib if pooled is None else pooled + contrib
        if i < k - 1:
            # x = ent_pool_i(x * mask_i, pool_i); mask_i folded into the
            # COLUMNS of a_ref[1+i], so aggregation acts on the masked x.
            h_bf = block(h_bf, a_ref[1 + i], plan["ent"][i]).astype(bf16)

    pooled_bf = pooled.astype(bf16)
    z_bf = jnp.maximum(matmul(pooled_bf, plan["lin1_w"]) + b_ref[plan["lin1_b"]],
                       0.0).astype(bf16)
    # F.dropout(p=0.5, training=False) -> identity
    o_ref[...] = matmul(z_bf, plan["lin2_w"]) + b_ref[plan["lin2_b"]]


def make_fused_forward(plan, k, alpha, g_pad, h_pad, num_graphs, num_classes):
    kernel = functools.partial(fused_forward_kernel, plan=plan, k=k, alpha=alpha)
    vmem = pl.BlockSpec(memory_space=pltpu.MemorySpace.VMEM)
    call = pl.pallas_call(
        kernel,
        out_shape=jax.ShapeDtypeStruct((g_pad, h_pad), jnp.float32),
        in_specs=[vmem] * 5,
        out_specs=vmem,
    )

    @jax.jit
    def fwd(x_pad, a_stack, p_stack, w_stack, b_stack):
        out_pad = call(x_pad, a_stack, p_stack, w_stack, b_stack)
        return out_pad[:num_graphs, :num_classes]

    return fwd


# ---------------------------------------------------------------------------
# Parameter initialization (deterministic, synthetic; BN folded into Linear)
# ---------------------------------------------------------------------------

def init_linear(key, din, dout):
    k1, k2 = jax.random.split(key)
    bound = 1.0 / jnp.sqrt(jnp.float32(din))
    w = jax.random.uniform(k1, (din, dout), jnp.float32, -bound, bound)
    b = jax.random.uniform(k2, (dout,), jnp.float32, -bound, bound)
    return w, b


def init_bn(key, d):
    k1, k2, k3 = jax.random.split(key, 3)
    gamma = 1.0 + 0.1 * jax.random.normal(k1, (d,), jnp.float32)
    beta = 0.1 * jax.random.normal(k2, (d,), jnp.float32)
    mean = 0.1 * jax.random.normal(k3, (d,), jnp.float32)
    var = jnp.ones((d,), jnp.float32)
    return gamma, beta, mean, var


def fold_bn(w, b, gamma, beta, mean, var, eps=1e-5):
    s = gamma / jnp.sqrt(var + eps)
    return w * s[None, :], (b - mean) * s + beta


def init_gin_mlp(key, din, dout):
    ks = jax.random.split(key, 4)
    w1, b1 = init_linear(ks[0], din, dout)
    w1, b1 = fold_bn(w1, b1, *init_bn(ks[1], dout))
    w2, b2 = init_linear(ks[2], dout, dout)
    w2, b2 = fold_bn(w2, b2, *init_bn(ks[3], dout))
    return (w1, b1, w2, b2)


def init_block(key, input_dim, hidden, num_layer):
    ks = jax.random.split(key, num_layer + 1)
    convs = []
    din = input_dim
    for l in range(num_layer):
        convs.append(init_gin_mlp(ks[l], din, hidden))
        din = hidden
    # JumpingKnowledge 'cat' of num_layer outputs -> Linear(num_layer*hidden, hidden)
    lw, lb = init_linear(ks[-1], hidden * num_layer, hidden)
    return {"convs": convs, "lin_w": lw, "lin_b": lb}


def init_model(key, num_features, hidden, num_classes, k):
    ks = jax.random.split(key, 2 * k + 2)
    embed_blocks = [init_block(ks[0], num_features, hidden, 3)]
    for i in range(1, k):
        embed_blocks.append(init_block(ks[i], hidden, hidden, 1))
    ent_pool = [init_block(ks[k + i], hidden, hidden, 1) for i in range(k - 1)]
    lin1_w, lin1_b = init_linear(ks[2 * k], hidden, hidden)
    lin2_w, lin2_b = init_linear(ks[2 * k + 1], hidden, num_classes)
    return {
        "embed_blocks": embed_blocks,
        "ent_pool": ent_pool,
        "lin1": (lin1_w, lin1_b),
        "lin2": (lin2_w, lin2_b),
    }


# ---------------------------------------------------------------------------
# Host-side packing: de-padded 32-wide slabs (HIDDEN == 32), mask folded into
# the pooling / pool-graph aggregation operators, stacked weight slabs.
# ---------------------------------------------------------------------------

def pad_to(a, shape):
    pads = [(0, t - s) for s, t in zip(a.shape, shape)]
    return jnp.pad(a, pads)


class ParamPacker:
    def __init__(self, pad_dim):
        self.pd = pad_dim
        self.mats = []
        self.biases = []

    def add_w(self, w):
        self.mats.append(pad_to(w, (self.pd, self.pd)))
        return len(self.mats) - 1

    def add_b(self, b):
        self.biases.append(pad_to(b.reshape(1, -1), (1, self.pd)))
        return len(self.biases) - 1

    def pack_block(self, bparams, hidden):
        convs = []
        for (w1, b1, w2, b2) in bparams["convs"]:
            convs.append((self.add_w(w1), self.add_b(b1),
                          self.add_w(w2), self.add_b(b2)))
        lw, lb = bparams["lin_w"], bparams["lin_b"]
        num_layer = len(bparams["convs"])
        jk_w = [self.add_w(lw[l * hidden:(l + 1) * hidden, :])
                for l in range(num_layer)]
        return {"convs": convs, "jk_w": jk_w, "jk_b": self.add_b(lb)}

    def stacks(self):
        w = jnp.stack(self.mats).astype(jnp.bfloat16)       # [NW, HP, HP]
        b = jnp.stack(self.biases).astype(jnp.float32)      # [NB, 1, HP]
        return w, b


def pack_model(params, hidden, pad_dim):
    pk = ParamPacker(pad_dim)
    plan = {
        "embed": [pk.pack_block(b, hidden) for b in params["embed_blocks"]],
        "ent": [pk.pack_block(b, hidden) for b in params["ent_pool"]],
    }
    plan["lin1_w"] = pk.add_w(params["lin1"][0])
    plan["lin1_b"] = pk.add_b(params["lin1"][1])
    plan["lin2_w"] = pk.add_w(params["lin2"][0])
    plan["lin2_b"] = pk.add_b(params["lin2"][1])
    w_stack, b_stack = pk.stacks()
    return plan, w_stack, b_stack


def dense_aggr_matrix(edge_index, n):
    """(I + A^T): row i sums source features of edges j->i plus x_i (GIN, eps=0).

    Duplicate / self edges accumulate, matching GINConv add-aggregation.
    """
    src, dst = edge_index[0], edge_index[1]
    a = jnp.zeros((n, n), jnp.float32).at[dst, src].add(1.0)
    return a + jnp.eye(n, dtype=jnp.float32)


def build_operands(x, edge_index, pools, layer_mask, batch,
                   n_pad, g_pad, h_pad, num_graphs):
    n = x.shape[0]
    k = layer_mask.shape[0] - 1
    x_pad = pad_to(x.astype(jnp.float32), (n_pad, h_pad))

    # a_stack[0]   = main-graph aggregation (unmasked, original edge_index).
    # a_stack[1+i] = pool-graph aggregation with layer_mask[i] folded into its
    # columns, so the kernel aggregates xx = x * mask_i without an extra op.
    a_list = [pad_to(dense_aggr_matrix(edge_index, n), (n_pad, n_pad))]
    for i in range(k - 1):
        a_pool = dense_aggr_matrix(pools[i], n) * layer_mask[i][None, :]
        a_list.append(pad_to(a_pool, (n_pad, n_pad)))
    a_stack = jnp.stack(a_list).astype(jnp.bfloat16)

    # Pool matrix per stage: one-hot(batch) with layer_mask[i] folded in.
    # Entries stay exact 0/1 in bf16; alpha_i is applied in f32 in-kernel.
    pool_base = (batch[None, :] == jnp.arange(num_graphs)[:, None]).astype(jnp.float32)
    p_list = [pad_to(pool_base * layer_mask[i][None, :], (g_pad, n_pad))
              for i in range(k)]
    p_stack = jnp.stack(p_list).astype(jnp.bfloat16)
    return x_pad, a_stack, p_stack


# ---------------------------------------------------------------------------
# Main
# ---------------------------------------------------------------------------

if __name__ == "__main__":
    key = jax.random.PRNGKey(0)

    N = 24           # nodes
    F_IN = 8         # dataset.num_features
    HIDDEN = 32
    NUM_CLASSES = 3
    G = 2            # graphs in the batch
    K = 3            # layer_mask.shape[0] - 1
    E = 64           # edges in the main graph
    E_POOL = 32      # edges in each pool graph

    H_PAD = 32       # HIDDEN == 32 -> no feature padding at all
    N_PAD = 32       # 24 nodes -> next multiple of the bf16 sublane tile (16)
    G_PAD = 8        # padded graph count (f32 sublane tile)

    k_x, k_ei, k_lm, k_p0, k_p1, k_params = jax.random.split(key, 6)

    x = jax.random.normal(k_x, (N, F_IN), jnp.float32)
    edge_index = jax.random.randint(k_ei, (2, E), 0, N, jnp.int32)
    layer_mask = (jax.random.uniform(k_lm, (K + 1, N)) > 0.3).astype(jnp.float32)
    batch = jnp.concatenate(
        [jnp.zeros((N // 2,), jnp.int32), jnp.ones((N - N // 2,), jnp.int32)]
    )
    pools = [
        jax.random.randint(k_p0, (2, E_POOL), 0, N, jnp.int32),
        jax.random.randint(k_p1, (2, E_POOL), 0, N, jnp.int32),
    ]
    alpha = (1.0, 0.7, 0.4)  # args.alpha (synthetic), exact f32 inside kernel

    params = init_model(k_params, F_IN, HIDDEN, NUM_CLASSES, K)

    # One-time host-side packing (BN fold already done at init; bias reshapes,
    # mask folding and the tiny N/F padding all happen here, outside the jit).
    plan, w_stack, b_stack = pack_model(params, HIDDEN, H_PAD)
    x_pad, a_stack, p_stack = build_operands(
        x, edge_index, pools, layer_mask, batch, N_PAD, G_PAD, H_PAD, G)

    fwd = make_fused_forward(plan, K, alpha, G_PAD, H_PAD, G, NUM_CLASSES)
    out = fwd(x_pad, a_stack, p_stack, w_stack, b_stack)
    out = jax.block_until_ready(out)

    assert out.shape == (G, NUM_CLASSES)
    assert jnp.all(jnp.isfinite(out))
    print("KERNEL_OK")
</pallas_src>

<mosaic_0001>
module attributes {stable_mosaic.version = 11 : i64} {
  func.func @fused_forward_kernel(%arg0: memref<32x32xf32, #tpu.memory_space<vmem>>, %arg1: memref<3x32x32xbf16, #tpu.memory_space<vmem>>, %arg2: memref<3x8x32xbf16, #tpu.memory_space<vmem>>, %arg3: memref<23x32x32xbf16, #tpu.memory_space<vmem>>, %arg4: memref<21x1x32xf32, #tpu.memory_space<vmem>>, %arg5: memref<8x32xf32, #tpu.memory_space<vmem>>) attributes {dimension_semantics = [], scalar_prefetch = 0 : i64, scratch_operands = 0 : i64, tpu.core_type = #tpu.core_type<tc>} {
    %c0 = arith.constant 0 : index
    %c0_0 = arith.constant 0 : index
    %0 = vector.load %arg0[%c0, %c0_0] : memref<32x32xf32, #tpu.memory_space<vmem>>, vector<32x32xf32>
    %1 = arith.truncf %0 : vector<32x32xf32> to vector<32x32xbf16>
    %c0_1 = arith.constant 0 : index
    %c0_2 = arith.constant 0 : index
    %c0_3 = arith.constant 0 : index
    %2 = vector.load %arg1[%c0_1, %c0_2, %c0_3] : memref<3x32x32xbf16, #tpu.memory_space<vmem>>, vector<1x32x32xbf16>
    %3 = vector.shape_cast %2 : vector<1x32x32xbf16> to vector<32x32xbf16>
    %cst = arith.constant dense<0.000000e+00> : vector<32x32xf32>
    %4 = tpu.matmul %3, %1, %cst {dimension_numbers = #tpu.dot_dimension_numbers<[1], [0], [0], [1], [0, 0, 1, 1], [], []>} : vector<32x32xbf16>, vector<32x32xbf16>, vector<32x32xf32> -> vector<32x32xf32>
    %5 = arith.truncf %4 : vector<32x32xf32> to vector<32x32xbf16>
    %c0_4 = arith.constant 0 : index
    %c0_5 = arith.constant 0 : index
    %c0_6 = arith.constant 0 : index
    %6 = vector.load %arg3[%c0_4, %c0_5, %c0_6] : memref<23x32x32xbf16, #tpu.memory_space<vmem>>, vector<1x32x32xbf16>
    %7 = vector.shape_cast %6 : vector<1x32x32xbf16> to vector<32x32xbf16>
    %cst_7 = arith.constant dense<0.000000e+00> : vector<32x32xf32>
    %8 = tpu.matmul %5, %7, %cst_7 {dimension_numbers = #tpu.dot_dimension_numbers<[1], [0], [0], [1], [0, 0, 1, 1], [], []>} : vector<32x32xbf16>, vector<32x32xbf16>, vector<32x32xf32> -> vector<32x32xf32>
    %c0_8 = arith.constant 0 : index
    %c0_9 = arith.constant 0 : index
    %c0_10 = arith.constant 0 : index
    %9 = vector.load %arg4[%c0_8, %c0_9, %c0_10] : memref<21x1x32xf32, #tpu.memory_space<vmem>>, vector<1x1x32xf32>
    %10 = vector.shape_cast %9 : vector<1x1x32xf32> to vector<1x32xf32>
    %11 = vector.broadcast %10 : vector<1x32xf32> to vector<32x32xf32>
    %12 = arith.addf %8, %11 : vector<32x32xf32>
    %cst_11 = arith.constant 0.000000e+00 : f32
    %13 = vector.broadcast %cst_11 : f32 to vector<32x32xf32>
    %14 = arith.maximumf %12, %13 : vector<32x32xf32>
    %15 = arith.truncf %14 : vector<32x32xf32> to vector<32x32xbf16>
    %c1 = arith.constant 1 : index
    %c0_12 = arith.constant 0 : index
    %c0_13 = arith.constant 0 : index
    %16 = vector.load %arg3[%c1, %c0_12, %c0_13] : memref<23x32x32xbf16, #tpu.memory_space<vmem>>, vector<1x32x32xbf16>
    %17 = vector.shape_cast %16 : vector<1x32x32xbf16> to vector<32x32xbf16>
    %cst_14 = arith.constant dense<0.000000e+00> : vector<32x32xf32>
    %18 = tpu.matmul %15, %17, %cst_14 {dimension_numbers = #tpu.dot_dimension_numbers<[1], [0], [0], [1], [0, 0, 1, 1], [], []>} : vector<32x32xbf16>, vector<32x32xbf16>, vector<32x32xf32> -> vector<32x32xf32>
    %c1_15 = arith.constant 1 : index
    %c0_16 = arith.constant 0 : index
    %c0_17 = arith.constant 0 : index
    %19 = vector.load %arg4[%c1_15, %c0_16, %c0_17] : memref<21x1x32xf32, #tpu.memory_space<vmem>>, vector<1x1x32xf32>
    %20 = vector.shape_cast %19 : vector<1x1x32xf32> to vector<1x32xf32>
    %21 = vector.broadcast %20 : vector<1x32xf32> to vector<32x32xf32>
    %22 = arith.addf %18, %21 : vector<32x32xf32>
    %cst_18 = arith.constant 0.000000e+00 : f32
    %23 = vector.broadcast %cst_18 : f32 to vector<32x32xf32>
    %24 = arith.maximumf %22, %23 : vector<32x32xf32>
    %25 = arith.truncf %24 : vector<32x32xf32> to vector<32x32xbf16>
    %c6 = arith.constant 6 : index
    %c0_19 = arith.constant 0 : index
    %c0_20 = arith.constant 0 : index
    %26 = vector.load %arg3[%c6, %c0_19, %c0_20] : memref<23x32x32xbf16, #tpu.memory_space<vmem>>, vector<1x32x32xbf16>
    %27 = vector.shape_cast %26 : vector<1x32x32xbf16> to vector<32x32xbf16>
    %cst_21 = arith.constant dense<0.000000e+00> : vector<32x32xf32>
    %28 = tpu.matmul %25, %27, %cst_21 {dimension_numbers = #tpu.dot_dimension_numbers<[1], [0], [0], [1], [0, 0, 1, 1], [], []>} : vector<32x32xbf16>, vector<32x32xbf16>, vector<32x32xf32> -> vector<32x32xf32>
    %cst_22 = arith.constant dense<0.000000e+00> : vector<32x32xf32>
    %29 = tpu.matmul %3, %25, %cst_22 {dimension_numbers = #tpu.dot_dimension_numbers<[1], [0], [0], [1], [0, 0, 1, 1], [], []>} : vector<32x32xbf16>, vector<32x32xbf16>, vector<32x32xf32> -> vector<32x32xf32>
    %30 = arith.truncf %29 : vector<32x32xf32> to vector<32x32xbf16>
    %c2 = arith.constant 2 : index
    %c0_23 = arith.constant 0 : index
    %c0_24 = arith.constant 0 : index
    %31 = vector.load %arg3[%c2, %c0_23, %c0_24] : memref<23x32x32xbf16, #tpu.memory_space<vmem>>, vector<1x32x32xbf16>
    %32 = vector.shape_cast %31 : vector<1x32x32xbf16> to vector<32x32xbf16>
    %cst_25 = arith.constant dense<0.000000e+00> : vector<32x32xf32>
    %33 = tpu.matmul %30, %32, %cst_25 {dimension_numbers = #tpu.dot_dimension_numbers<[1], [0], [0], [1], [0, 0, 1, 1], [], []>} : vector<32x32xbf16>, vector<32x32xbf16>, vector<32x32xf32> -> vector<32x32xf32>
    %c2_26 = arith.constant 2 : index
    %c0_27 = arith.constant 0 : index
    %c0_28 = arith.constant 0 : index
    %34 = vector.load %arg4[%c2_26, %c0_27, %c0_28] : memref<21x1x32xf32, #tpu.memory_space<vmem>>, vector<1x1x32xf32>
    %35 = vector.shape_cast %34 : vector<1x1x32xf32> to vector<1x32xf32>
    %36 = vector.broadcast %35 : vector<1x32xf32> to vector<32x32xf32>
    %37 = arith.addf %33, %36 : vector<32x32xf32>
    %cst_29 = arith.constant 0.000000e+00 : f32
    %38 = vector.broadcast %cst_29 : f32 to vector<32x32xf32>
    %39 = arith.maximumf %37, %38 : vector<32x32xf32>
    %40 = arith.truncf %39 : vector<32x32xf32> to vector<32x32xbf16>
    %c3 = arith.constant 3 : index
    %c0_30 = arith.constant 0 : index
    %c0_31 = arith.constant 0 : index
    %41 = vector.load %arg3[%c3, %c0_30, %c0_31] : memref<23x32x32xbf16, #tpu.memory_space<vmem>>, vector<1x32x32xbf16>
    %42 = vector.shape_cast %41 : vector<1x32x32xbf16> to vector<32x32xbf16>
    %cst_32 = arith.constant dense<0.000000e+00> : vector<32x32xf32>
    %43 = tpu.matmul %40, %42, %cst_32 {dimension_numbers = #tpu.dot_dimension_numbers<[1], [0], [0], [1], [0, 0, 1, 1], [], []>} : vector<32x32xbf16>, vector<32x32xbf16>, vector<32x32xf32> -> vector<32x32xf32>
    %c3_33 = arith.constant 3 : index
    %c0_34 = arith.constant 0 : index
    %c0_35 = arith.constant 0 : index
    %44 = vector.load %arg4[%c3_33, %c0_34, %c0_35] : memref<21x1x32xf32, #tpu.memory_space<vmem>>, vector<1x1x32xf32>
    %45 = vector.shape_cast %44 : vector<1x1x32xf32> to vector<1x32xf32>
    %46 = vector.broadcast %45 : vector<1x32xf32> to vector<32x32xf32>
    %47 = arith.addf %43, %46 : vector<32x32xf32>
    %cst_36 = arith.constant 0.000000e+00 : f32
    %48 = vector.broadcast %cst_36 : f32 to vector<32x32xf32>
    %49 = arith.maximumf %47, %48 : vector<32x32xf32>
    %50 = arith.truncf %49 : vector<32x32xf32> to vector<32x32xbf16>
    %c7 = arith.constant 7 : index
    %c0_37 = arith.constant 0 : index
    %c0_38 = arith.constant 0 : index
    %51 = vector.load %arg3[%c7, %c0_37, %c0_38] : memref<23x32x32xbf16, #tpu.memory_space<vmem>>, vector<1x32x32xbf16>
    %52 = vector.shape_cast %51 : vector<1x32x32xbf16> to vector<32x32xbf16>
    %cst_39 = arith.constant dense<0.000000e+00> : vector<32x32xf32>
    %53 = tpu.matmul %50, %52, %cst_39 {dimension_numbers = #tpu.dot_dimension_numbers<[1], [0], [0], [1], [0, 0, 1, 1], [], []>} : vector<32x32xbf16>, vector<32x32xbf16>, vector<32x32xf32> -> vector<32x32xf32>
    %54 = arith.addf %28, %53 : vector<32x32xf32>
    %cst_40 = arith.constant dense<0.000000e+00> : vector<32x32xf32>
    %55 = tpu.matmul %3, %50, %cst_40 {dimension_numbers = #tpu.dot_dimension_numbers<[1], [0], [0], [1], [0, 0, 1, 1], [], []>} : vector<32x32xbf16>, vector<32x32xbf16>, vector<32x32xf32> -> vector<32x32xf32>
    %56 = arith.truncf %55 : vector<32x32xf32> to vector<32x32xbf16>
    %c4 = arith.constant 4 : index
    %c0_41 = arith.constant 0 : index
    %c0_42 = arith.constant 0 : index
    %57 = vector.load %arg3[%c4, %c0_41, %c0_42] : memref<23x32x32xbf16, #tpu.memory_space<vmem>>, vector<1x32x32xbf16>
    %58 = vector.shape_cast %57 : vector<1x32x32xbf16> to vector<32x32xbf16>
    %cst_43 = arith.constant dense<0.000000e+00> : vector<32x32xf32>
    %59 = tpu.matmul %56, %58, %cst_43 {dimension_numbers = #tpu.dot_dimension_numbers<[1], [0], [0], [1], [0, 0, 1, 1], [], []>} : vector<32x32xbf16>, vector<32x32xbf16>, vector<32x32xf32> -> vector<32x32xf32>
    %c4_44 = arith.constant 4 : index
    %c0_45 = arith.constant 0 : index
    %c0_46 = arith.constant 0 : index
    %60 = vector.load %arg4[%c4_44, %c0_45, %c0_46] : memref<21x1x32xf32, #tpu.memory_space<vmem>>, vector<1x1x32xf32>
    %61 = vector.shape_cast %60 : vector<1x1x32xf32> to vector<1x32xf32>
    %62 = vector.broadcast %61 : vector<1x32xf32> to vector<32x32xf32>
    %63 = arith.addf %59, %62 : vector<32x32xf32>
    %cst_47 = arith.constant 0.000000e+00 : f32
    %64 = vector.broadcast %cst_47 : f32 to vector<32x32xf32>
    %65 = arith.maximumf %63, %64 : vector<32x32xf32>
    %66 = arith.truncf %65 : vector<32x32xf32> to vector<32x32xbf16>
    %c5 = arith.constant 5 : index
    %c0_48 = arith.constant 0 : index
    %c0_49 = arith.constant 0 : index
    %67 = vector.load %arg3[%c5, %c0_48, %c0_49] : memref<23x32x32xbf16, #tpu.memory_space<vmem>>, vector<1x32x32xbf16>
    %68 = vector.shape_cast %67 : vector<1x32x32xbf16> to vector<32x32xbf16>
    %cst_50 = arith.constant dense<0.000000e+00> : vector<32x32xf32>
    %69 = tpu.matmul %66, %68, %cst_50 {dimension_numbers = #tpu.dot_dimension_numbers<[1], [0], [0], [1], [0, 0, 1, 1], [], []>} : vector<32x32xbf16>, vector<32x32xbf16>, vector<32x32xf32> -> vector<32x32xf32>
    %c5_51 = arith.constant 5 : index
    %c0_52 = arith.constant 0 : index
    %c0_53 = arith.constant 0 : index
    %70 = vector.load %arg4[%c5_51, %c0_52, %c0_53] : memref<21x1x32xf32, #tpu.memory_space<vmem>>, vector<1x1x32xf32>
    %71 = vector.shape_cast %70 : vector<1x1x32xf32> to vector<1x32xf32>
    %72 = vector.broadcast %71 : vector<1x32xf32> to vector<32x32xf32>
    %73 = arith.addf %69, %72 : vector<32x32xf32>
    %cst_54 = arith.constant 0.000000e+00 : f32
    %74 = vector.broadcast %cst_54 : f32 to vector<32x32xf32>
    %75 = arith.maximumf %73, %74 : vector<32x32xf32>
    %76 = arith.truncf %75 : vector<32x32xf32> to vector<32x32xbf16>
    %c8 = arith.constant 8 : index
    %c0_55 = arith.constant 0 : index
    %c0_56 = arith.constant 0 : index
    %77 = vector.load %arg3[%c8, %c0_55, %c0_56] : memref<23x32x32xbf16, #tpu.memory_space<vmem>>, vector<1x32x32xbf16>
    %78 = vector.shape_cast %77 : vector<1x32x32xbf16> to vector<32x32xbf16>
    %cst_57 = arith.constant dense<0.000000e+00> : vector<32x32xf32>
    %79 = tpu.matmul %76, %78, %cst_57 {dimension_numbers = #tpu.dot_dimension_numbers<[1], [0], [0], [1], [0, 0, 1, 1], [], []>} : vector<32x32xbf16>, vector<32x32xbf16>, vector<32x32xf32> -> vector<32x32xf32>
    %80 = arith.addf %54, %79 : vector<32x32xf32>
    %c6_58 = arith.constant 6 : index
    %c0_59 = arith.constant 0 : index
    %c0_60 = arith.constant 0 : index
    %81 = vector.load %arg4[%c6_58, %c0_59, %c0_60] : memref<21x1x32xf32, #tpu.memory_space<vmem>>, vector<1x1x32xf32>
    %82 = vector.shape_cast %81 : vector<1x1x32xf32> to vector<1x32xf32>
    %83 = vector.broadcast %82 : vector<1x32xf32> to vector<32x32xf32>
    %84 = arith.addf %80, %83 : vector<32x32xf32>
    %cst_61 = arith.constant 0.000000e+00 : f32
    %85 = vector.broadcast %cst_61 : f32 to vector<32x32xf32>
    %86 = arith.maximumf %84, %85 : vector<32x32xf32>
    %87 = arith.truncf %86 : vector<32x32xf32> to vector<32x32xbf16>
    %c0_62 = arith.constant 0 : index
    %c0_63 = arith.constant 0 : index
    %c0_64 = arith.constant 0 : index
    %88 = vector.load %arg2[%c0_62, %c0_63, %c0_64] : memref<3x8x32xbf16, #tpu.memory_space<vmem>>, vector<1x8x32xbf16>
    %89 = vector.shape_cast %88 : vector<1x8x32xbf16> to vector<8x32xbf16>
    %cst_65 = arith.constant dense<0.000000e+00> : vector<8x32xf32>
    %90 = tpu.matmul %89, %87, %cst_65 {dimension_numbers = #tpu.dot_dimension_numbers<[1], [0], [0], [1], [0, 0, 1, 1], [], []>} : vector<8x32xbf16>, vector<32x32xbf16>, vector<8x32xf32> -> vector<8x32xf32>
    %cst_66 = arith.constant 1.000000e+00 : f32
    %91 = vector.broadcast %cst_66 : f32 to vector<8x32xf32>
    %92 = arith.mulf %91, %90 : vector<8x32xf32>
    %c1_67 = arith.constant 1 : index
    %c0_68 = arith.constant 0 : index
    %c0_69 = arith.constant 0 : index
    %93 = vector.load %arg1[%c1_67, %c0_68, %c0_69] : memref<3x32x32xbf16, #tpu.memory_space<vmem>>, vector<1x32x32xbf16>
    %94 = vector.shape_cast %93 : vector<1x32x32xbf16> to vector<32x32xbf16>
    %cst_70 = arith.constant dense<0.000000e+00> : vector<32x32xf32>
    %95 = tpu.matmul %94, %87, %cst_70 {dimension_numbers = #tpu.dot_dimension_numbers<[1], [0], [0], [1], [0, 0, 1, 1], [], []>} : vector<32x32xbf16>, vector<32x32xbf16>, vector<32x32xf32> -> vector<32x32xf32>
    %96 = arith.truncf %95 : vector<32x32xf32> to vector<32x32xbf16>
    %c15 = arith.constant 15 : index
    %c0_71 = arith.constant 0 : index
    %c0_72 = arith.constant 0 : index
    %97 = vector.load %arg3[%c15, %c0_71, %c0_72] : memref<23x32x32xbf16, #tpu.memory_space<vmem>>, vector<1x32x32xbf16>
    %98 = vector.shape_cast %97 : vector<1x32x32xbf16> to vector<32x32xbf16>
    %cst_73 = arith.constant dense<0.000000e+00> : vector<32x32xf32>
    %99 = tpu.matmul %96, %98, %cst_73 {dimension_numbers = #tpu.dot_dimension_numbers<[1], [0], [0], [1], [0, 0, 1, 1], [], []>} : vector<32x32xbf16>, vector<32x32xbf16>, vector<32x32xf32> -> vector<32x32xf32>
    %c13 = arith.constant 13 : index
    %c0_74 = arith.constant 0 : index
    %c0_75 = arith.constant 0 : index
    %100 = vector.load %arg4[%c13, %c0_74, %c0_75] : memref<21x1x32xf32, #tpu.memory_space<vmem>>, vector<1x1x32xf32>
    %101 = vector.shape_cast %100 : vector<1x1x32xf32> to vector<1x32xf32>
    %102 = vector.broadcast %101 : vector<1x32xf32> to vector<32x32xf32>
    %103 = arith.addf %99, %102 : vector<32x32xf32>
    %cst_76 = arith.constant 0.000000e+00 : f32
    %104 = vector.broadcast %cst_76 : f32 to vector<32x32xf32>
    %105 = arith.maximumf %103, %104 : vector<32x32xf32>
    %106 = arith.truncf %105 : vector<32x32xf32> to vector<32x32xbf16>
    %c16 = arith.constant 16 : index
    %c0_77 = arith.constant 0 : index
    %c0_78 = arith.constant 0 : index
    %107 = vector.load %arg3[%c16, %c0_77, %c0_78] : memref<23x32x32xbf16, #tpu.memory_space<vmem>>, vector<1x32x32xbf16>
    %108 = vector.shape_cast %107 : vector<1x32x32xbf16> to vector<32x32xbf16>
    %cst_79 = arith.constant dense<0.000000e+00> : vector<32x32xf32>
    %109 = tpu.matmul %106, %108, %cst_79 {dimension_numbers = #tpu.dot_dimension_numbers<[1], [0], [0], [1], [0, 0, 1, 1], [], []>} : vector<32x32xbf16>, vector<32x32xbf16>, vector<32x32xf32> -> vector<32x32xf32>
    %c14 = arith.constant 14 : index
    %c0_80 = arith.constant 0 : index
    %c0_81 = arith.constant 0 : index
    %110 = vector.load %arg4[%c14, %c0_80, %c0_81] : memref<21x1x32xf32, #tpu.memory_space<vmem>>, vector<1x1x32xf32>
    %111 = vector.shape_cast %110 : vector<1x1x32xf32> to vector<1x32xf32>
    %112 = vector.broadcast %111 : vector<1x32xf32> to vector<32x32xf32>
    %113 = arith.addf %109, %112 : vector<32x32xf32>
    %cst_82 = arith.constant 0.000000e+00 : f32
    %114 = vector.broadcast %cst_82 : f32 to vector<32x32xf32>
    %115 = arith.maximumf %113, %114 : vector<32x32xf32>
    %116 = arith.truncf %115 : vector<32x32xf32> to vector<32x32xbf16>
    %c17 = arith.constant 17 : index
    %c0_83 = arith.constant 0 : index
    %c0_84 = arith.constant 0 : index
    %117 = vector.load %arg3[%c17, %c0_83, %c0_84] : memref<23x32x32xbf16, #tpu.memory_space<vmem>>, vector<1x32x32xbf16>
    %118 = vector.shape_cast %117 : vector<1x32x32xbf16> to vector<32x32xbf16>
    %cst_85 = arith.constant dense<0.000000e+00> : vector<32x32xf32>
    %119 = tpu.matmul %116, %118, %cst_85 {dimension_numbers = #tpu.dot_dimension_numbers<[1], [0], [0], [1], [0, 0, 1, 1], [], []>} : vector<32x32xbf16>, vector<32x32xbf16>, vector<32x32xf32> -> vector<32x32xf32>
    %c15_86 = arith.constant 15 : index
    %c0_87 = arith.constant 0 : index
    %c0_88 = arith.constant 0 : index
    %120 = vector.load %arg4[%c15_86, %c0_87, %c0_88] : memref<21x1x32xf32, #tpu.memory_space<vmem>>, vector<1x1x32xf32>
    %121 = vector.shape_cast %120 : vector<1x1x32xf32> to vector<1x32xf32>
    %122 = vector.broadcast %121 : vector<1x32xf32> to vector<32x32xf32>
    %123 = arith.addf %119, %122 : vector<32x32xf32>
    %124 = arith.truncf %123 : vector<32x32xf32> to vector<32x32xbf16>
    %cst_89 = arith.constant dense<0.000000e+00> : vector<32x32xf32>
    %125 = tpu.matmul %3, %124, %cst_89 {dimension_numbers = #tpu.dot_dimension_numbers<[1], [0], [0], [1], [0, 0, 1, 1], [], []>} : vector<32x32xbf16>, vector<32x32xbf16>, vector<32x32xf32> -> vector<32x32xf32>
    %126 = arith.truncf %125 : vector<32x32xf32> to vector<32x32xbf16>
    %c9 = arith.constant 9 : index
    %c0_90 = arith.constant 0 : index
    %c0_91 = arith.constant 0 : index
    %127 = vector.load %arg3[%c9, %c0_90, %c0_91] : memref<23x32x32xbf16, #tpu.memory_space<vmem>>, vector<1x32x32xbf16>
    %128 = vector.shape_cast %127 : vector<1x32x32xbf16> to vector<32x32xbf16>
    %cst_92 = arith.constant dense<0.000000e+00> : vector<32x32xf32>
    %129 = tpu.matmul %126, %128, %cst_92 {dimension_numbers = #tpu.dot_dimension_numbers<[1], [0], [0], [1], [0, 0, 1, 1], [], []>} : vector<32x32xbf16>, vector<32x32xbf16>, vector<32x32xf32> -> vector<32x32xf32>
    %c7_93 = arith.constant 7 : index
    %c0_94 = arith.constant 0 : index
    %c0_95 = arith.constant 0 : index
    %130 = vector.load %arg4[%c7_93, %c0_94, %c0_95] : memref<21x1x32xf32, #tpu.memory_space<vmem>>, vector<1x1x32xf32>
    %131 = vector.shape_cast %130 : vector<1x1x32xf32> to vector<1x32xf32>
    %132 = vector.broadcast %131 : vector<1x32xf32> to vector<32x32xf32>
    %133 = arith.addf %129, %132 : vector<32x32xf32>
    %cst_96 = arith.constant 0.000000e+00 : f32
    %134 = vector.broadcast %cst_96 : f32 to vector<32x32xf32>
    %135 = arith.maximumf %133, %134 : vector<32x32xf32>
    %136 = arith.truncf %135 : vector<32x32xf32> to vector<32x32xbf16>
    %c10 = arith.constant 10 : index
    %c0_97 = arith.constant 0 : index
    %c0_98 = arith.constant 0 : index
    %137 = vector.load %arg3[%c10, %c0_97, %c0_98] : memref<23x32x32xbf16, #tpu.memory_space<vmem>>, vector<1x32x32xbf16>
    %138 = vector.shape_cast %137 : vector<1x32x32xbf16> to vector<32x32xbf16>
    %cst_99 = arith.constant dense<0.000000e+00> : vector<32x32xf32>
    %139 = tpu.matmul %136, %138, %cst_99 {dimension_numbers = #tpu.dot_dimension_numbers<[1], [0], [0], [1], [0, 0, 1, 1], [], []>} : vector<32x32xbf16>, vector<32x32xbf16>, vector<32x32xf32> -> vector<32x32xf32>
    %c8_100 = arith.constant 8 : index
    %c0_101 = arith.constant 0 : index
    %c0_102 = arith.constant 0 : index
    %140 = vector.load %arg4[%c8_100, %c0_101, %c0_102] : memref<21x1x32xf32, #tpu.memory_space<vmem>>, vector<1x1x32xf32>
    %141 = vector.shape_cast %140 : vector<1x1x32xf32> to vector<1x32xf32>
    %142 = vector.broadcast %141 : vector<1x32xf32> to vector<32x32xf32>
    %143 = arith.addf %139, %142 : vector<32x32xf32>
    %cst_103 = arith.constant 0.000000e+00 : f32
    %144 = vector.broadcast %cst_103 : f32 to vector<32x32xf32>
    %145 = arith.maximumf %143, %144 : vector<32x32xf32>
    %146 = arith.truncf %145 : vector<32x32xf32> to vector<32x32xbf16>
    %c11 = arith.constant 11 : index
    %c0_104 = arith.constant 0 : index
    %c0_105 = arith.constant 0 : index
    %147 = vector.load %arg3[%c11, %c0_104, %c0_105] : memref<23x32x32xbf16, #tpu.memory_space<vmem>>, vector<1x32x32xbf16>
    %148 = vector.shape_cast %147 : vector<1x32x32xbf16> to vector<32x32xbf16>
    %cst_106 = arith.constant dense<0.000000e+00> : vector<32x32xf32>
    %149 = tpu.matmul %146, %148, %cst_106 {dimension_numbers = #tpu.dot_dimension_numbers<[1], [0], [0], [1], [0, 0, 1, 1], [], []>} : vector<32x32xbf16>, vector<32x32xbf16>, vector<32x32xf32> -> vector<32x32xf32>
    %c9_107 = arith.constant 9 : index
    %c0_108 = arith.constant 0 : index
    %c0_109 = arith.constant 0 : index
    %150 = vector.load %arg4[%c9_107, %c0_108, %c0_109] : memref<21x1x32xf32, #tpu.memory_space<vmem>>, vector<1x1x32xf32>
    %151 = vector.shape_cast %150 : vector<1x1x32xf32> to vector<1x32xf32>
    %152 = vector.broadcast %151 : vector<1x32xf32> to vector<32x32xf32>
    %153 = arith.addf %149, %152 : vector<32x32xf32>
    %cst_110 = arith.constant 0.000000e+00 : f32
    %154 = vector.broadcast %cst_110 : f32 to vector<32x32xf32>
    %155 = arith.maximumf %153, %154 : vector<32x32xf32>
    %156 = arith.truncf %155 : vector<32x32xf32> to vector<32x32xbf16>
    %c1_111 = arith.constant 1 : index
    %c0_112 = arith.constant 0 : index
    %c0_113 = arith.constant 0 : index
    %157 = vector.load %arg2[%c1_111, %c0_112, %c0_113] : memref<3x8x32xbf16, #tpu.memory_space<vmem>>, vector<1x8x32xbf16>
    %158 = vector.shape_cast %157 : vector<1x8x32xbf16> to vector<8x32xbf16>
    %cst_114 = arith.constant dense<0.000000e+00> : vector<8x32xf32>
    %159 = tpu.matmul %158, %156, %cst_114 {dimension_numbers = #tpu.dot_dimension_numbers<[1], [0], [0], [1], [0, 0, 1, 1], [], []>} : vector<8x32xbf16>, vector<32x32xbf16>, vector<8x32xf32> -> vector<8x32xf32>
    %cst_115 = arith.constant 0.699999988 : f32
    %160 = vector.broadcast %cst_115 : f32 to vector<8x32xf32>
    %161 = arith.mulf %160, %159 : vector<8x32xf32>
    %162 = arith.addf %92, %161 : vector<8x32xf32>
    %c2_116 = arith.constant 2 : index
    %c0_117 = arith.constant 0 : index
    %c0_118 = arith.constant 0 : index
    %163 = vector.load %arg1[%c2_116, %c0_117, %c0_118] : memref<3x32x32xbf16, #tpu.memory_space<vmem>>, vector<1x32x32xbf16>
    %164 = vector.shape_cast %163 : vector<1x32x32xbf16> to vector<32x32xbf16>
    %cst_119 = arith.constant dense<0.000000e+00> : vector<32x32xf32>
    %165 = tpu.matmul %164, %156, %cst_119 {dimension_numbers = #tpu.dot_dimension_numbers<[1], [0], [0], [1], [0, 0, 1, 1], [], []>} : vector<32x32xbf16>, vector<32x32xbf16>, vector<32x32xf32> -> vector<32x32xf32>
    %166 = arith.truncf %165 : vector<32x32xf32> to vector<32x32xbf16>
    %c18 = arith.constant 18 : index
    %c0_120 = arith.constant 0 : index
    %c0_121 = arith.constant 0 : index
    %167 = vector.load %arg3[%c18, %c0_120, %c0_121] : memref<23x32x32xbf16, #tpu.memory_space<vmem>>, vector<1x32x32xbf16>
    %168 = vector.shape_cast %167 : vector<1x32x32xbf16> to vector<32x32xbf16>
    %cst_122 = arith.constant dense<0.000000e+00> : vector<32x32xf32>
    %169 = tpu.matmul %166, %168, %cst_122 {dimension_numbers = #tpu.dot_dimension_numbers<[1], [0], [0], [1], [0, 0, 1, 1], [], []>} : vector<32x32xbf16>, vector<32x32xbf16>, vector<32x32xf32> -> vector<32x32xf32>
    %c16_123 = arith.constant 16 : index
    %c0_124 = arith.constant 0 : index
    %c0_125 = arith.constant 0 : index
    %170 = vector.load %arg4[%c16_123, %c0_124, %c0_125] : memref<21x1x32xf32, #tpu.memory_space<vmem>>, vector<1x1x32xf32>
    %171 = vector.shape_cast %170 : vector<1x1x32xf32> to vector<1x32xf32>
    %172 = vector.broadcast %171 : vector<1x32xf32> to vector<32x32xf32>
    %173 = arith.addf %169, %172 : vector<32x32xf32>
    %cst_126 = arith.constant 0.000000e+00 : f32
    %174 = vector.broadcast %cst_126 : f32 to vector<32x32xf32>
    %175 = arith.maximumf %173, %174 : vector<32x32xf32>
    %176 = arith.truncf %175 : vector<32x32xf32> to vector<32x32xbf16>
    %c19 = arith.constant 19 : index
    %c0_127 = arith.constant 0 : index
    %c0_128 = arith.constant 0 : index
    %177 = vector.load %arg3[%c19, %c0_127, %c0_128] : memref<23x32x32xbf16, #tpu.memory_space<vmem>>, vector<1x32x32xbf16>
    %178 = vector.shape_cast %177 : vector<1x32x32xbf16> to vector<32x32xbf16>
    %cst_129 = arith.constant dense<0.000000e+00> : vector<32x32xf32>
    %179 = tpu.matmul %176, %178, %cst_129 {dimension_numbers = #tpu.dot_dimension_numbers<[1], [0], [0], [1], [0, 0, 1, 1], [], []>} : vector<32x32xbf16>, vector<32x32xbf16>, vector<32x32xf32> -> vector<32x32xf32>
    %c17_130 = arith.constant 17 : index
    %c0_131 = arith.constant 0 : index
    %c0_132 = arith.constant 0 : index
    %180 = vector.load %arg4[%c17_130, %c0_131, %c0_132] : memref<21x1x32xf32, #tpu.memory_space<vmem>>, vector<1x1x32xf32>
    %181 = vector.shape_cast %180 : vector<1x1x32xf32> to vector<1x32xf32>
    %182 = vector.broadcast %181 : vector<1x32xf32> to vector<32x32xf32>
    %183 = arith.addf %179, %182 : vector<32x32xf32>
    %cst_133 = arith.constant 0.000000e+00 : f32
    %184 = vector.broadcast %cst_133 : f32 to vector<32x32xf32>
    %185 = arith.maximumf %183, %184 : vector<32x32xf32>
    %186 = arith.truncf %185 : vector<32x32xf32> to vector<32x32xbf16>
    %c20 = arith.constant 20 : index
    %c0_134 = arith.constant 0 : index
    %c0_135 = arith.constant 0 : index
    %187 = vector.load %arg3[%c20, %c0_134, %c0_135] : memref<23x32x32xbf16, #tpu.memory_space<vmem>>, vector<1x32x32xbf16>
    %188 = vector.shape_cast %187 : vector<1x32x32xbf16> to vector<32x32xbf16>
    %cst_136 = arith.constant dense<0.000000e+00> : vector<32x32xf32>
    %189 = tpu.matmul %186, %188, %cst_136 {dimension_numbers = #tpu.dot_dimension_numbers<[1], [0], [0], [1], [0, 0, 1, 1], [], []>} : vector<32x32xbf16>, vector<32x32xbf16>, vector<32x32xf32> -> vector<32x32xf32>
    %c18_137 = arith.constant 18 : index
    %c0_138 = arith.constant 0 : index
    %c0_139 = arith.constant 0 : index
    %190 = vector.load %arg4[%c18_137, %c0_138, %c0_139] : memref<21x1x32xf32, #tpu.memory_space<vmem>>, vector<1x1x32xf32>
    %191 = vector.shape_cast %190 : vector<1x1x32xf32> to vector<1x32xf32>
    %192 = vector.broadcast %191 : vector<1x32xf32> to vector<32x32xf32>
    %193 = arith.addf %189, %192 : vector<32x32xf32>
    %194 = arith.truncf %193 : vector<32x32xf32> to vector<32x32xbf16>
    %cst_140 = arith.constant dense<0.000000e+00> : vector<32x32xf32>
    %195 = tpu.matmul %3, %194, %cst_140 {dimension_numbers = #tpu.dot_dimension_numbers<[1], [0], [0], [1], [0, 0, 1, 1], [], []>} : vector<32x32xbf16>, vector<32x32xbf16>, vector<32x32xf32> -> vector<32x32xf32>
    %196 = arith.truncf %195 : vector<32x32xf32> to vector<32x32xbf16>
    %c12 = arith.constant 12 : index
    %c0_141 = arith.constant 0 : index
    %c0_142 = arith.constant 0 : index
    %197 = vector.load %arg3[%c12, %c0_141, %c0_142] : memref<23x32x32xbf16, #tpu.memory_space<vmem>>, vector<1x32x32xbf16>
    %198 = vector.shape_cast %197 : vector<1x32x32xbf16> to vector<32x32xbf16>
    %cst_143 = arith.constant dense<0.000000e+00> : vector<32x32xf32>
    %199 = tpu.matmul %196, %198, %cst_143 {dimension_numbers = #tpu.dot_dimension_numbers<[1], [0], [0], [1], [0, 0, 1, 1], [], []>} : vector<32x32xbf16>, vector<32x32xbf16>, vector<32x32xf32> -> vector<32x32xf32>
    %c10_144 = arith.constant 10 : index
    %c0_145 = arith.constant 0 : index
    %c0_146 = arith.constant 0 : index
    %200 = vector.load %arg4[%c10_144, %c0_145, %c0_146] : memref<21x1x32xf32, #tpu.memory_space<vmem>>, vector<1x1x32xf32>
    %201 = vector.shape_cast %200 : vector<1x1x32xf32> to vector<1x32xf32>
    %202 = vector.broadcast %201 : vector<1x32xf32> to vector<32x32xf32>
    %203 = arith.addf %199, %202 : vector<32x32xf32>
    %cst_147 = arith.constant 0.000000e+00 : f32
    %204 = vector.broadcast %cst_147 : f32 to vector<32x32xf32>
    %205 = arith.maximumf %203, %204 : vector<32x32xf32>
    %206 = arith.truncf %205 : vector<32x32xf32> to vector<32x32xbf16>
    %c13_148 = arith.constant 13 : index
    %c0_149 = arith.constant 0 : index
    %c0_150 = arith.constant 0 : index
    %207 = vector.load %arg3[%c13_148, %c0_149, %c0_150] : memref<23x32x32xbf16, #tpu.memory_space<vmem>>, vector<1x32x32xbf16>
    %208 = vector.shape_cast %207 : vector<1x32x32xbf16> to vector<32x32xbf16>
    %cst_151 = arith.constant dense<0.000000e+00> : vector<32x32xf32>
    %209 = tpu.matmul %206, %208, %cst_151 {dimension_numbers = #tpu.dot_dimension_numbers<[1], [0], [0], [1], [0, 0, 1, 1], [], []>} : vector<32x32xbf16>, vector<32x32xbf16>, vector<32x32xf32> -> vector<32x32xf32>
    %c11_152 = arith.constant 11 : index
    %c0_153 = arith.constant 0 : index
    %c0_154 = arith.constant 0 : index
    %210 = vector.load %arg4[%c11_152, %c0_153, %c0_154] : memref<21x1x32xf32, #tpu.memory_space<vmem>>, vector<1x1x32xf32>
    %211 = vector.shape_cast %210 : vector<1x1x32xf32> to vector<1x32xf32>
    %212 = vector.broadcast %211 : vector<1x32xf32> to vector<32x32xf32>
    %213 = arith.addf %209, %212 : vector<32x32xf32>
    %cst_155 = arith.constant 0.000000e+00 : f32
    %214 = vector.broadcast %cst_155 : f32 to vector<32x32xf32>
    %215 = arith.maximumf %213, %214 : vector<32x32xf32>
    %216 = arith.truncf %215 : vector<32x32xf32> to vector<32x32xbf16>
    %c14_156 = arith.constant 14 : index
    %c0_157 = arith.constant 0 : index
    %c0_158 = arith.constant 0 : index
    %217 = vector.load %arg3[%c14_156, %c0_157, %c0_158] : memref<23x32x32xbf16, #tpu.memory_space<vmem>>, vector<1x32x32xbf16>
    %218 = vector.shape_cast %217 : vector<1x32x32xbf16> to vector<32x32xbf16>
    %cst_159 = arith.constant dense<0.000000e+00> : vector<32x32xf32>
    %219 = tpu.matmul %216, %218, %cst_159 {dimension_numbers = #tpu.dot_dimension_numbers<[1], [0], [0], [1], [0, 0, 1, 1], [], []>} : vector<32x32xbf16>, vector<32x32xbf16>, vector<32x32xf32> -> vector<32x32xf32>
    %c12_160 = arith.constant 12 : index
    %c0_161 = arith.constant 0 : index
    %c0_162 = arith.constant 0 : index
    %220 = vector.load %arg4[%c12_160, %c0_161, %c0_162] : memref<21x1x32xf32, #tpu.memory_space<vmem>>, vector<1x1x32xf32>
    %221 = vector.shape_cast %220 : vector<1x1x32xf32> to vector<1x32xf32>
    %222 = vector.broadcast %221 : vector<1x32xf32> to vector<32x32xf32>
    %223 = arith.addf %219, %222 : vector<32x32xf32>
    %cst_163 = arith.constant 0.000000e+00 : f32
    %224 = vector.broadcast %cst_163 : f32 to vector<32x32xf32>
    %225 = arith.maximumf %223, %224 : vector<32x32xf32>
    %226 = arith.truncf %225 : vector<32x32xf32> to vector<32x32xbf16>
    %c2_164 = arith.constant 2 : index
    %c0_165 = arith.constant 0 : index
    %c0_166 = arith.constant 0 : index
    %227 = vector.load %arg2[%c2_164, %c0_165, %c0_166] : memref<3x8x32xbf16, #tpu.memory_space<vmem>>, vector<1x8x32xbf16>
    %228 = vector.shape_cast %227 : vector<1x8x32xbf16> to vector<8x32xbf16>
    %cst_167 = arith.constant dense<0.000000e+00> : vector<8x32xf32>
    %229 = tpu.matmul %228, %226, %cst_167 {dimension_numbers = #tpu.dot_dimension_numbers<[1], [0], [0], [1], [0, 0, 1, 1], [], []>} : vector<8x32xbf16>, vector<32x32xbf16>, vector<8x32xf32> -> vector<8x32xf32>
    %cst_168 = arith.constant 4.000000e-01 : f32
    %230 = vector.broadcast %cst_168 : f32 to vector<8x32xf32>
    %231 = arith.mulf %230, %229 : vector<8x32xf32>
    %232 = arith.addf %162, %231 : vector<8x32xf32>
    %233 = arith.truncf %232 : vector<8x32xf32> to vector<8x32xbf16>
    %c21 = arith.constant 21 : index
    %c0_169 = arith.constant 0 : index
    %c0_170 = arith.constant 0 : index
    %234 = vector.load %arg3[%c21, %c0_169, %c0_170] : memref<23x32x32xbf16, #tpu.memory_space<vmem>>, vector<1x32x32xbf16>
    %235 = vector.shape_cast %234 : vector<1x32x32xbf16> to vector<32x32xbf16>
    %cst_171 = arith.constant dense<0.000000e+00> : vector<8x32xf32>
    %236 = tpu.matmul %233, %235, %cst_171 {dimension_numbers = #tpu.dot_dimension_numbers<[1], [0], [0], [1], [0, 0, 1, 1], [], []>} : vector<8x32xbf16>, vector<32x32xbf16>, vector<8x32xf32> -> vector<8x32xf32>
    %c19_172 = arith.constant 19 : index
    %c0_173 = arith.constant 0 : index
    %c0_174 = arith.constant 0 : index
    %237 = vector.load %arg4[%c19_172, %c0_173, %c0_174] : memref<21x1x32xf32, #tpu.memory_space<vmem>>, vector<1x1x32xf32>
    %238 = vector.shape_cast %237 : vector<1x1x32xf32> to vector<1x32xf32>
    %239 = vector.broadcast %238 : vector<1x32xf32> to vector<8x32xf32>
    %240 = arith.addf %236, %239 : vector<8x32xf32>
    %cst_175 = arith.constant 0.000000e+00 : f32
    %241 = vector.broadcast %cst_175 : f32 to vector<8x32xf32>
    %242 = arith.maximumf %240, %241 : vector<8x32xf32>
    %243 = arith.truncf %242 : vector<8x32xf32> to vector<8x32xbf16>
    %c22 = arith.constant 22 : index
    %c0_176 = arith.constant 0 : index
    %c0_177 = arith.constant 0 : index
    %244 = vector.load %arg3[%c22, %c0_176, %c0_177] : memref<23x32x32xbf16, #tpu.memory_space<vmem>>, vector<1x32x32xbf16>
    %245 = vector.shape_cast %244 : vector<1x32x32xbf16> to vector<32x32xbf16>
    %cst_178 = arith.constant dense<0.000000e+00> : vector<8x32xf32>
    %246 = tpu.matmul %243, %245, %cst_178 {dimension_numbers = #tpu.dot_dimension_numbers<[1], [0], [0], [1], [0, 0, 1, 1], [], []>} : vector<8x32xbf16>, vector<32x32xbf16>, vector<8x32xf32> -> vector<8x32xf32>
    %c20_179 = arith.constant 20 : index
    %c0_180 = arith.constant 0 : index
    %c0_181 = arith.constant 0 : index
    %247 = vector.load %arg4[%c20_179, %c0_180, %c0_181] : memref<21x1x32xf32, #tpu.memory_space<vmem>>, vector<1x1x32xf32>
    %248 = vector.shape_cast %247 : vector<1x1x32xf32> to vector<1x32xf32>
    %249 = vector.broadcast %248 : vector<1x32xf32> to vector<8x32xf32>
    %250 = arith.addf %246, %249 : vector<8x32xf32>
    %c0_182 = arith.constant 0 : index
    %c0_183 = arith.constant 0 : index
    %251 = vector.load %arg5[%c0_182, %c0_183] : memref<8x32xf32, #tpu.memory_space<vmem>>, vector<8x32xf32>
    tpu.vector_store %arg5[%c0_182, %c0_183], %250 {strides = array<i32>} : memref<8x32xf32, #tpu.memory_space<vmem>>, vector<8x32xf32>,
    return
  }
}

</mosaic_0001>

<bundles_post_ra>
// kernel: fwd.1
= control target key start
LH: loop header
LB: loop body
LE: loop exit
PB: predicated region body
PF: predicated region fallthrough
CT: control target
= control target key end

     0   :  { %10 = vsyncpa [#allocation3], 0  ;;  %s2164_s0 = inlined_call_operand.hbm [shape: f32[32,32], index: 0, kind: input, shape index: {}]   ;;  %s2165_s1 = inlined_call_operand.hbm [shape: bf16[3,32,32], index: 1, kind: input, shape index: {}]   ;;  %s2166_s2 = inlined_call_operand.hbm [shape: bf16[3,8,32], index: 2, kind: input, shape index: {}]   ;;  %s2167_s3 = inlined_call_operand.hbm [shape: bf16[23,32,32], index: 3, kind: input, shape index: {}]   ;;  %s2168_s4 = inlined_call_operand.hbm [shape: f32[21,1,32], index: 4, kind: input, shape index: {}]   ;;  %s2169_s5 = inlined_call_operand.vmem [shape: f32[8,32], index: 5, kind: output, shape index: {}]  }
   0x1   :  { %11 = vsyncpa [#allocation5], 0  ;;  %s30_s20 = sshll.u32 %s2165_s1, 4  ;;  %s31_s20 = int_to_ptr.hbm [resolvable:$true] %s30_s20 }
   0x2   :  { %12 = vsyncpa [#allocation8], 0  ;;  %s2026_s21 = smov [#allocation4]   ;;  %s56_s25 = sshll.u32 %s2167_s3, 4  ;;  %s57_s25 = int_to_ptr.hbm [resolvable:$true] %s56_s25 }
   0x3   :  { %s32_s22 = sshll.u32 %s2026_s21, 4  ;;  %s2027_s26 = smov 64   ;;  %s33_s22 = int_to_ptr.vmem [resolvable:$true] %s32_s22 }
   0x4   :  { %s2028_s27 = smov 4   ;;  %s2029_s28 = smov [#allocation7]  }
   0x5   :  { %38 = dma.hbm_to_vmem [thread:$0]  %s31_s20, 768, %s33_s22, [#allocation5], %s2027_s26, %s2027_s26, %s2028_s27  }
   0x6   :  { %s58_s29 = sshll.u32 %s2029_s28, 4  ;;  %s17_s7 = sshll.u32 %s2164_s0, 4  ;;  %s59_s29 = int_to_ptr.vmem [resolvable:$true] %s58_s29  ;;  %s18_s7 = int_to_ptr.hbm [resolvable:$true] %s17_s7 }
   0x7   :  { %64 = dma.hbm_to_vmem [thread:$0]  %s57_s25, 5888, %s59_s29, [#allocation8], %s2027_s26, %s2027_s26, %s2028_s27  }
   0x8   :  { %s2030_s1 = smov [#allocation2]   ;;  %s43_s3 = sshll.u32 %s2166_s2, 4  ;;  %s44_s3 = int_to_ptr.hbm [resolvable:$true] %s43_s3 }
   0x9   :  { %s19_s8 = sshll.u32 %s2030_s1, 4  ;;  %s2031_s11 = smov 128   ;;  %s20_s8 = int_to_ptr.vmem [resolvable:$true] %s19_s8 }
   0xa   :  { %s2032_s12 = smov 8   ;;  %s2033_s13 = smov [#allocation6]  }
   0xb   :  { %25 = dma.hbm_to_vmem [thread:$0]  %s18_s7, 512, %s20_s8, [#allocation3], %s2031_s11, %s2031_s11, %s2032_s12  }
   0xc   :  { %s45_s14 = sshll.u32 %s2033_s13, 4  ;;  %s69_s0 = sshll.u32 %s2168_s4, 4  ;;  %s46_s14 = int_to_ptr.vmem [resolvable:$true] %s45_s14  ;;  %s70_s0 = int_to_ptr.hbm [resolvable:$true] %s69_s0 }
   0xd   :  { %51 = dma.hbm_to_vmem [thread:$0]  %s44_s3, 192, %s46_s14, [#allocation5], %s2027_s26, %s2027_s26, %s2028_s27  }
   0xe   :  { %s2034_s17 = smov [#allocation9]   ;;  %s2035_s19 = smov 16  }
   0xf   :  { %s71_s18 = sshll.u32 %s2034_s17, 4  ;;  %s2036_s20 = smov 1   ;;  %s72_s18 = int_to_ptr.vmem [resolvable:$true] %s71_s18 }
  0x10   :  { %77 = dma.hbm_to_vmem [thread:$0]  %s70_s0, 336, %s72_s18, [#allocation8], %s2035_s19, %s2035_s19, %s2036_s20  }
  0x11   :  { %2020 = dma.done.wait [#allocation3], 512  }
  0x12   :  { %2021 = vsyncadd [#allocation3], 4294966784 }
  0x13   :  { %2022 = dma.done.wait [#allocation5], 960  }
  0x14   :  { %2023 = vsyncadd [#allocation5], 4294966336 }
  0x15   :  { %2024 = dma.done.wait [#allocation8], 6224  }
  0x16   :  { %2025 = vsyncadd [#allocation8], 4294961072  ;;  %v101_v0 = vld [vmem:[#allocation2 + $0x10] sm:$0xff]  ;;  %v102_v1 = vld [vmem:[#allocation2 + $0x18] sm:$0xff]  ;;  %vm119_vm0 = vcmask 261120  }
  0x17   :  { %v99_v2 = vld [vmem:[#allocation2] sm:$0xff]  ;;  %v104_v3 = vpack.c.bf16 %v102_v1, %v101_v0  ;;  %v100_v4 = vld [vmem:[#allocation2 + $0x8] sm:$0xff]  ;;  %v1821_v16 = vld [vmem:[#allocation7 + $0x18] sm:$0xff] }
  0x18   :  { %v103_v5 = vpack.c.bf16 %v100_v4, %v99_v2  ;;  %v2082_v6 = vld [vmem:[#allocation4] sm:$0xff]  ;;  %v2086_v7 = vld [vmem:[#allocation4 + $0x8] sm:$0xff]  ;;  %232 = vmatpush.bf16.msra.mxu2 %v1821_v16  ;;  %v1827_v58 = vld [vmem:[#allocation7 + $0x38] sm:$0xff] }
  0x19   :  { %132 = vmatpush.bf16.msra.mxu0 %v104_v3  ;;  %v1819_v8 = vld [vmem:[#allocation7 + $0x8] sm:$0xff]  ;;  %v1818_v9 = vld [vmem:[#allocation7] sm:$0xff]  ;;  %v1820_v17 = vld [vmem:[#allocation7 + $0x10] sm:$0xff] }
  0x1a   :  { %179 = vmatpush.bf16.msra.mxu1 %v1819_v8  ;;  %v1879_v19 = vld [vmem:[#allocation9] ss:$0 sm:$0xff]  ;;  %v1880_v36 = vld [vmem:[#allocation9 + $0x1] ss:$0 sm:$0xff]  ;;  %v1823_v47 = vld [vmem:[#allocation7 + $0x68] sm:$0xff] }
  0x1b   :  { %v1822_v49 = vld [vmem:[#allocation7 + $0x60] sm:$0xff]  ;;  %v1825_v50 = vld [vmem:[#allocation7 + $0x28] sm:$0xff]  ;;  %v1826_v59 = vld [vmem:[#allocation7 + $0x30] sm:$0xff] }
  0x1c   :  { %233 = vmatpush.bf16.msra.mxu2 %v1820_v17  ;;  %v1824_v51 = vld [vmem:[#allocation7 + $0x20] sm:$0xff]  ;;  %v1881_v61 = vld [vmem:[#allocation9 + $0x2] ss:$0 sm:$0xff]  ;;  %v1882_v16 = vld [vmem:[#allocation9 + $0x3] ss:$0 sm:$0xff] }
  0x1d   :  { %133 = vmatpush.bf16.msra.mxu0 %v103_v5 }
  0x1e   :  { %180 = vmatpush.bf16.msra.mxu1 %v1818_v9 }
  0x20   :  { %1555 = vmatmul.msk.bf16.vlgmr.msra.gmra.mxu0 %vm119_vm0, %v2082_v6 }
  0x21   :  { %311 = vmatpush.bf16.msrb.mxu0 %v1825_v50 }
  0x22   :  { %364 = vmatpush.bf16.msrb.mxu1 %v1827_v58  ;;  %v1834_v58 = vld [vmem:[#allocation7 + $0x80] sm:$0xff] }
  0x25   :  { %312 = vmatpush.bf16.msrb.mxu0 %v1824_v51 }
  0x26   :  { %365 = vmatpush.bf16.msrb.mxu1 %v1826_v59 }
  0x30   :  { %1556 = vmatmul.msk.bf16.gmra.mxu0 %vm119_vm0, %v2086_v7 }
  0x9d   :  { %v135_v10 = vpop.f32.mrf.mxu0 }
  0xa5   :  { %v137_v11 = vpop.f32.mrf.mxu0 }
  0xa6   :  { %v145_v12 = vpack.c.bf16 %v137_v11, %v135_v10 }
  0xa8   :  { %1565 = vmatmul.msk.bf16.vlgmr.msra.gmra.mxu1 %vm119_vm0, %v145_v12 }
  0xad   :  { %v140_v13 = vpop.f32.mrf.mxu0 }
  0xb5   :  { %v142_v14 = vpop.f32.mrf.mxu0 }
  0xb6   :  { %v146_v15 = vpack.c.bf16 %v142_v14, %v140_v13  ;;  %v1829_v13 = vld [vmem:[#allocation7 + $0x78] sm:$0xff]  ;;  %v1828_v14 = vld [vmem:[#allocation7 + $0x70] sm:$0xff] }
  0xb7   :  { %412 = vmatpush.bf16.msrb.mxu2 %v1829_v13 }
  0xb8   :  { %1566 = vmatmul.msk.bf16.gmra.mxu1 %vm119_vm0, %v146_v15 }
  0xbb   :  { %413 = vmatpush.bf16.msrb.mxu2 %v1828_v14 }
 0x125   :  { %v182_v18 = vpop.f32.mrf.mxu1 }
 0x126   :  { %v183_v20 = vadd.f32 %v1879_v19, %v182_v18 }
 0x128   :  { %v192_v23 = vmax.f32 %v183_v20, 0.0 }
 0x12d   :  { %v184_v21 = vpop.f32.mrf.mxu1 }
 0x12e   :  { %v185_v22 = vadd.f32 %v1879_v19, %v184_v21 }
 0x130   :  { %v193_v24 = vmax.f32 %v185_v22, 0.0 }
 0x132   :  { %v196_v25 = vpack.c.bf16 %v193_v24, %v192_v23 }
 0x134   :  { %1575 = vmatmul.msk.bf16.vlgmr.msra.gmra.mxu2 %vm119_vm0, %v196_v25 }
 0x135   :  { %v187_v26 = vpop.f32.mrf.mxu1 }
 0x136   :  { %v188_v27 = vadd.f32 %v1879_v19, %v187_v26 }
 0x138   :  { %v194_v30 = vmax.f32 %v188_v27, 0.0 }
 0x13d   :  { %v189_v28 = vpop.f32.mrf.mxu1 }
 0x13e   :  { %v190_v29 = vadd.f32 %v1879_v19, %v189_v28 }
 0x140   :  { %v195_v31 = vmax.f32 %v190_v29, 0.0 }
 0x142   :  { %v197_v32 = vpack.c.bf16 %v195_v31, %v194_v30  ;;  %v1831_v30 = vld [vmem:[#allocation7 + $0x48] sm:$0xff]  ;;  %v1830_v31 = vld [vmem:[#allocation7 + $0x40] sm:$0xff] }
 0x143   :  { %517 = vmatpush.bf16.msra.mxu1 %v1831_v30 }
 0x144   :  { %1576 = vmatmul.msk.bf16.gmra.mxu2 %vm119_vm0, %v197_v32 }
 0x147   :  { %518 = vmatpush.bf16.msra.mxu1 %v1830_v31 }
 0x1b7   :  { %v235_v33 = vpop.f32.mrf.mxu2 }
 0x1b8   :  { %v236_v41 = vadd.f32 %v1880_v36, %v235_v33 }
 0x1ba   :  { %v245_v46 = vmax.f32 %v236_v41, 0.0  ;;  %v1883_v41 = vld [vmem:[#allocation9 + $0x4] ss:$0 sm:$0xff] }
 0x1bf   :  { %v237_v34 = vpop.f32.mrf.mxu2 }
 0x1c0   :  { %v238_v39 = vadd.f32 %v1880_v36, %v237_v34 }
 0x1c2   :  { %v246_v44 = vmax.f32 %v238_v39, 0.0  ;;  %v1832_v39 = vld [vmem:[#allocation7 + $0x50] sm:$0xff] }
 0x1c4   :  { %v249_v48 = vpack.c.bf16 %v246_v44, %v245_v46 }
 0x1c7   :  { %v240_v35 = vpop.f32.mrf.mxu2 }
 0x1c8   :  { %v241_v37 = vadd.f32 %v1880_v36, %v240_v35 }
 0x1ca   :  { %v247_v42 = vmax.f32 %v241_v37, 0.0 }
 0x1cf   :  { %v242_v38 = vpop.f32.mrf.mxu2 }
 0x1d0   :  { %v243_v40 = vadd.f32 %v1880_v36, %v242_v38  ;;  %v1833_v38 = vld [vmem:[#allocation7 + $0x58] sm:$0xff] }
 0x1d1   :  { %570 = vmatpush.bf16.msra.mxu2 %v1833_v38 }
 0x1d2   :  { %v248_v43 = vmax.f32 %v243_v40, 0.0 }
 0x1d4   :  { %v250_v45 = vpack.c.bf16 %v248_v43, %v247_v42 }
 0x1d5   :  { %571 = vmatpush.bf16.msra.mxu2 %v1832_v39 }
 0x1d6   :  { %262 = vmatpush.bf16.msra.mxu3 %v250_v45 }
 0x1da   :  { %263 = vmatpush.bf16.msra.mxu3 %v249_v48 }
 0x1dd   :  { %1577 = vmatmul.msk.bf16.vlgmr.msra.gmra.mxu3 %vm119_vm0, %v2082_v6 }
 0x1de   :  { %449 = vmatpush.bf16.msrb.mxu3 %v1823_v47 }
 0x1e2   :  { %450 = vmatpush.bf16.msrb.mxu3 %v1822_v49 }
 0x1ed   :  { %1578 = vmatmul.msk.bf16.gmra.mxu3 %vm119_vm0, %v2086_v7 }
 0x1fd   :  { %1617 = vmatmul.msk.bf16.vlgmr.msrb.gmra.mxu3 %vm119_vm0, %v249_v48 }
 0x20d   :  { %1618 = vmatmul.msk.bf16.gmra.mxu3 %vm119_vm0, %v250_v45 }
 0x260   :  { %v265_v52 = vpop.f32.mrf.mxu3 }
 0x268   :  { %v267_v53 = vpop.f32.mrf.mxu3 }
 0x269   :  { %v275_v54 = vpack.c.bf16 %v267_v53, %v265_v52 }
 0x26b   :  { %1587 = vmatmul.msk.bf16.vlgmr.msrb.gmra.mxu0 %vm119_vm0, %v275_v54 }
 0x270   :  { %v270_v55 = vpop.f32.mrf.mxu3 }
 0x278   :  { %v272_v56 = vpop.f32.mrf.mxu3 }
 0x279   :  { %v276_v57 = vpack.c.bf16 %v272_v56, %v270_v55 }
 0x27b   :  { %1588 = vmatmul.msk.bf16.gmra.mxu0 %vm119_vm0, %v276_v57  ;;  %v1835_v57 = vld [vmem:[#allocation7 + $0x88] sm:$0xff] }
 0x27c   :  { %618 = vmatpush.bf16.msra.mxu3 %v1835_v57 }
 0x280   :  { %619 = vmatpush.bf16.msra.mxu3 %v1834_v58  ;;  %v452_v14 = vpop.f32.mrf.mxu3 }
 0x2e8   :  { %v314_v60 = vpop.f32.mrf.mxu0 }
 0x2e9   :  { %v315_v62 = vadd.f32 %v1881_v61, %v314_v60 }
 0x2eb   :  { %v324_v1 = vmax.f32 %v315_v62, 0.0  ;;  %v1884_v62 = vld [vmem:[#allocation9 + $0x5] ss:$0 sm:$0xff] }
 0x2f0   :  { %v316_v63 = vpop.f32.mrf.mxu0 }
 0x2f1   :  { %v317_v0 = vadd.f32 %v1881_v61, %v316_v63 }
 0x2f3   :  { %v325_v2 = vmax.f32 %v317_v0, 0.0 }
 0x2f5   :  { %v328_v3 = vpack.c.bf16 %v325_v2, %v324_v1 }
 0x2f7   :  { %1597 = vmatmul.msk.bf16.vlgmr.msrb.gmra.mxu1 %vm119_vm0, %v328_v3 }
 0x2f8   :  { %v319_v4 = vpop.f32.mrf.mxu0 }
 0x2f9   :  { %v320_v5 = vadd.f32 %v1881_v61, %v319_v4 }
 0x2fb   :  { %v326_v10 = vmax.f32 %v320_v5, 0.0 }
 0x300   :  { %v321_v8 = vpop.f32.mrf.mxu0 }
 0x301   :  { %v322_v9 = vadd.f32 %v1881_v61, %v321_v8 }
 0x303   :  { %v327_v11 = vmax.f32 %v322_v9, 0.0 }
 0x305   :  { %v329_v12 = vpack.c.bf16 %v327_v11, %v326_v10 }
 0x307   :  { %1598 = vmatmul.msk.bf16.gmra.mxu1 %vm119_vm0, %v329_v12 }
 0x374   :  { %v367_v15 = vpop.f32.mrf.mxu1 }
 0x375   :  { %v368_v17 = vadd.f32 %v1882_v16, %v367_v15  ;;  %v454_v15 = vpop.f32.mrf.mxu3 }
 0x377   :  { %v377_v20 = vmax.f32 %v368_v17, 0.0 }
 0x37c   :  { %v369_v18 = vpop.f32.mrf.mxu1 }
 0x37d   :  { %v370_v19 = vadd.f32 %v1882_v16, %v369_v18 }
 0x37f   :  { %v378_v21 = vmax.f32 %v370_v19, 0.0 }
 0x381   :  { %v381_v22 = vpack.c.bf16 %v378_v21, %v377_v20 }
 0x383   :  { %1607 = vmatmul.msk.bf16.vlgmr.msrb.gmra.mxu2 %vm119_vm0, %v381_v22 }
 0x384   :  { %v372_v23 = vpop.f32.mrf.mxu1 }
 0x385   :  { %v373_v24 = vadd.f32 %v1882_v16, %v372_v23 }
 0x387   :  { %v379_v27 = vmax.f32 %v373_v24, 0.0 }
 0x38c   :  { %v374_v25 = vpop.f32.mrf.mxu1 }
 0x38d   :  { %v375_v26 = vadd.f32 %v1882_v16, %v374_v25  ;;  %v457_v16 = vpop.f32.mrf.mxu3 }
 0x38f   :  { %v380_v28 = vmax.f32 %v375_v26, 0.0  ;;  %v1885_v26 = vld [vmem:[#allocation9 + $0x6] ss:$0 sm:$0xff] }
 0x391   :  { %v382_v29 = vpack.c.bf16 %v380_v28, %v379_v27 }
 0x393   :  { %1608 = vmatmul.msk.bf16.gmra.mxu2 %vm119_vm0, %v382_v29  ;;  %468 = vmatpush.bf16.msra.mxu0 %v382_v29 }
 0x395   :  { %v459_v17 = vpop.f32.mrf.mxu3 }
 0x397   :  { %469 = vmatpush.bf16.msra.mxu0 %v381_v22 }
 0x39a   :  { %1619 = vmatmul.msk.bf16.vlgmr.msra.gmra.mxu0 %vm119_vm0, %v2082_v6 }
 0x3aa   :  { %1620 = vmatmul.msk.bf16.gmra.mxu0 %vm119_vm0, %v2086_v7 }
 0x406   :  { %v415_v55 = vpop.f32.mrf.mxu2 }
 0x407   :  { %v453_v24 = vadd.f32 %v452_v14, %v415_v55 }
 0x40e   :  { %v417_v56 = vpop.f32.mrf.mxu2 }
 0x40f   :  { %v455_v22 = vadd.f32 %v454_v15, %v417_v56  ;;  %v1886_v56 = vld [vmem:[#allocation9 + $0xd] ss:$0 sm:$0xff] }
 0x416   :  { %v420_v59 = vpop.f32.mrf.mxu2 }
 0x417   :  { %v471_v32 = vpop.f32.mrf.mxu0  ;;  %v458_v21 = vadd.f32 %v457_v16, %v420_v59 }
 0x41e   :  { %v422_v60 = vpop.f32.mrf.mxu2 }
 0x41f   :  { %v473_v33 = vpop.f32.mrf.mxu0  ;;  %v460_v25 = vadd.f32 %v459_v17, %v422_v60 }
 0x420   :  { %v481_v34 = vpack.c.bf16 %v473_v33, %v471_v32 }
 0x422   :  { %1629 = vmatmul.msk.bf16.vlgmr.msra.gmra.mxu1 %vm119_vm0, %v481_v34 }
 0x427   :  { %v476_v35 = vpop.f32.mrf.mxu0 }
 0x42f   :  { %v478_v36 = vpop.f32.mrf.mxu0 }
 0x430   :  { %v482_v37 = vpack.c.bf16 %v478_v36, %v476_v35 }
 0x432   :  { %1630 = vmatmul.msk.bf16.gmra.mxu1 %vm119_vm0, %v482_v37 }
 0x49f   :  { %v520_v40 = vpop.f32.mrf.mxu1 }
 0x4a0   :  { %v521_v42 = vadd.f32 %v1883_v41, %v520_v40 }
 0x4a2   :  { %v530_v45 = vmax.f32 %v521_v42, 0.0  ;;  %v1837_v42 = vld [vmem:[#allocation4 + $0x18] sm:$0xff] }
 0x4a7   :  { %v522_v43 = vpop.f32.mrf.mxu1 }
 0x4a8   :  { %v523_v44 = vadd.f32 %v1883_v41, %v522_v43  ;;  %v1839_v43 = vld [vmem:[#allocation7 + $0xf8] sm:$0xff] }
 0x4a9   :  { %727 = vmatpush.bf16.msrb.mxu1 %v1839_v43  ;;  %v1846_v43 = vld [vmem:[#allocation7 + $0xa0] sm:$0xff] }
 0x4aa   :  { %v531_v46 = vmax.f32 %v523_v44, 0.0  ;;  %v1838_v44 = vld [vmem:[#allocation7 + $0xf0] sm:$0xff] }
 0x4ac   :  { %v534_v47 = vpack.c.bf16 %v531_v46, %v530_v45  ;;  %v1845_v45 = vld [vmem:[#allocation7 + $0x98] sm:$0xff]  ;;  %v1844_v46 = vld [vmem:[#allocation7 + $0x90] sm:$0xff] }
 0x4ad   :  { %728 = vmatpush.bf16.msrb.mxu1 %v1838_v44 }
 0x4ae   :  { %1639 = vmatmul.msk.bf16.vlgmr.msra.gmra.mxu2 %vm119_vm0, %v534_v47 }
 0x4af   :  { %v525_v48 = vpop.f32.mrf.mxu1 }
 0x4b0   :  { %v526_v49 = vadd.f32 %v1883_v41, %v525_v48 }
 0x4b1   :  { %903 = vmatpush.bf16.msra.mxu1 %v1845_v45  ;;  %v1889_v45 = vld [vmem:[#allocation9 + $0x7] ss:$0 sm:$0xff] }
 0x4b2   :  { %v532_v52 = vmax.f32 %v526_v49, 0.0 }
 0x4b5   :  { %904 = vmatpush.bf16.msra.mxu1 %v1844_v46 }
 0x4b7   :  { %v527_v50 = vpop.f32.mrf.mxu1 }
 0x4b8   :  { %v528_v51 = vadd.f32 %v1883_v41, %v527_v50  ;;  %v1836_v41 = vld [vmem:[#allocation4 + $0x10] sm:$0xff] }
 0x4ba   :  { %v533_v53 = vmax.f32 %v528_v51, 0.0 }
 0x4bc   :  { %v535_v54 = vpack.c.bf16 %v533_v53, %v532_v52  ;;  %v1841_v53 = vld [vmem:[#allocation7 + $0x108] sm:$0xff] }
 0x4bd   :  { %780 = vmatpush.bf16.msrb.mxu2 %v1841_v53 }
 0x4be   :  { %1640 = vmatmul.msk.bf16.gmra.mxu2 %vm119_vm0, %v535_v54  ;;  %v1840_v54 = vld [vmem:[#allocation7 + $0x100] sm:$0xff] }
 0x4c1   :  { %781 = vmatpush.bf16.msrb.mxu2 %v1840_v54 }
 0x531   :  { %v573_v61 = vpop.f32.mrf.mxu2 }
 0x532   :  { %v574_v63 = vadd.f32 %v1884_v62, %v573_v61 }
 0x534   :  { %v583_v2 = vmax.f32 %v574_v63, 0.0 }
 0x539   :  { %v575_v0 = vpop.f32.mrf.mxu2 }
 0x53a   :  { %v576_v1 = vadd.f32 %v1884_v62, %v575_v0 }
 0x53c   :  { %v584_v3 = vmax.f32 %v576_v1, 0.0 }
 0x53e   :  { %v587_v4 = vpack.c.bf16 %v584_v3, %v583_v2 }
 0x540   :  { %1649 = vmatmul.msk.bf16.vlgmr.msra.gmra.mxu3 %vm119_vm0, %v587_v4 }
 0x541   :  { %v578_v5 = vpop.f32.mrf.mxu2 }
 0x542   :  { %v579_v8 = vadd.f32 %v1884_v62, %v578_v5 }
 0x544   :  { %v585_v11 = vmax.f32 %v579_v8, 0.0  ;;  %v1843_v8 = vld [vmem:[#allocation7 + $0x118] sm:$0xff] }
 0x545   :  { %833 = vmatpush.bf16.msrb.mxu3 %v1843_v8 }
 0x549   :  { %v580_v9 = vpop.f32.mrf.mxu2 }
 0x54a   :  { %v581_v10 = vadd.f32 %v1884_v62, %v580_v9  ;;  %v1842_v9 = vld [vmem:[#allocation7 + $0x110] sm:$0xff] }
 0x54b   :  { %834 = vmatpush.bf16.msrb.mxu3 %v1842_v9 }
 0x54c   :  { %v586_v12 = vmax.f32 %v581_v10, 0.0 }
 0x54e   :  { %v588_v13 = vpack.c.bf16 %v586_v12, %v585_v11  ;;  %v1887_v11 = vld [vmem:[#allocation9 + $0xe] ss:$0 sm:$0xff] }
 0x550   :  { %1650 = vmatmul.msk.bf16.gmra.mxu3 %vm119_vm0, %v588_v13 }
 0x5c3   :  { %v621_v18 = vpop.f32.mrf.mxu3 }
 0x5c4   :  { %v631_v29 = vadd.f32 %v621_v18, %v453_v24 }
 0x5c6   :  { %v640_v34 = vadd.f32 %v1885_v26, %v631_v29 }
 0x5c8   :  { %v644_v39 = vmax.f32 %v640_v34, 0.0 }
 0x5cb   :  { %v623_v19 = vpop.f32.mrf.mxu3 }
 0x5cc   :  { %v632_v27 = vadd.f32 %v623_v19, %v455_v22 }
 0x5ce   :  { %v641_v32 = vadd.f32 %v1885_v26, %v632_v27 }
 0x5d0   :  { %v645_v37 = vmax.f32 %v641_v32, 0.0 }
 0x5d2   :  { %v648_v40 = vpack.c.bf16 %v645_v37, %v644_v39 }
 0x5d3   :  { %v626_v20 = vpop.f32.mrf.mxu3 }
 0x5d4   :  { %v633_v23 = vadd.f32 %v626_v20, %v458_v21 }
 0x5d6   :  { %v642_v30 = vadd.f32 %v1885_v26, %v633_v23 }
 0x5d8   :  { %v646_v35 = vmax.f32 %v642_v30, 0.0 }
 0x5db   :  { %v628_v28 = vpop.f32.mrf.mxu3 }
 0x5dc   :  { %v634_v31 = vadd.f32 %v628_v28, %v460_v25  ;;  %v1888_v28 = vld [vmem:[#allocation9 + $0xf] ss:$0 sm:$0xff] }
 0x5de   :  { %v643_v33 = vadd.f32 %v1885_v26, %v634_v31 }
 0x5e0   :  { %v647_v36 = vmax.f32 %v643_v33, 0.0 }
 0x5e2   :  { %v649_v38 = vpack.c.bf16 %v647_v36, %v646_v35 }
 0x5e4   :  { %678 = vmatpush.bf16.msrb.mxu0 %v649_v38 }
 0x5e8   :  { %679 = vmatpush.bf16.msrb.mxu0 %v648_v40 }
 0x5eb   :  { %1659 = vmatmul.msk.bf16.vlgmr.msrb.gmra.mxu0 %vm119_vm0, %v1836_v41 }
 0x5fb   :  { %1660 = vmatmul.msk.bf16.gmra.mxu0 %vm119_vm0, %v1837_v42  ;;  %v1847_v42 = vld [vmem:[#allocation7 + $0xa8] sm:$0xff] }
 0x5fc   :  { %956 = vmatpush.bf16.msra.mxu2 %v1847_v42  ;;  %v1854_v42 = vld [vmem:[#allocation7 + $0x130] sm:$0xff] }
 0x600   :  { %957 = vmatpush.bf16.msra.mxu2 %v1846_v43 }
 0x668   :  { %v681_v47 = vpop.f32.mrf.mxu0 }
 0x670   :  { %v683_v48 = vpop.f32.mrf.mxu0 }
 0x671   :  { %v691_v49 = vpack.c.bf16 %v683_v48, %v681_v47 }
 0x673   :  { %1669 = vmatmul.msk.bf16.vlgmr.msrb.gmra.mxu1 %vm119_vm0, %v691_v49 }
 0x674   :  { %1056 = vmatpush.bf16.msrb.mxu1 %v649_v38 }
 0x678   :  { %1057 = vmatpush.bf16.msrb.mxu1 %v648_v40  ;;  %v686_v50 = vpop.f32.mrf.mxu0 }
 0x680   :  { %v688_v51 = vpop.f32.mrf.mxu0 }
 0x681   :  { %v692_v52 = vpack.c.bf16 %v688_v51, %v686_v50 }
 0x683   :  { %1670 = vmatmul.msk.bf16.gmra.mxu1 %vm119_vm0, %v692_v52 }
 0x6f0   :  { %v730_v55 = vpop.f32.mrf.mxu1 }
 0x6f1   :  { %v731_v57 = vadd.f32 %v1886_v56, %v730_v55 }
 0x6f3   :  { %v740_v60 = vmax.f32 %v731_v57, 0.0 }
 0x6f8   :  { %v732_v58 = vpop.f32.mrf.mxu1 }
 0x6f9   :  { %v733_v59 = vadd.f32 %v1886_v56, %v732_v58 }
 0x6fb   :  { %v741_v61 = vmax.f32 %v733_v59, 0.0  ;;  %v1849_v59 = vld [vmem:[#allocation7 + $0xb8] sm:$0xff] }
 0x6fc   :  { %1009 = vmatpush.bf16.msra.mxu3 %v1849_v59 }
 0x6fd   :  { %v744_v62 = vpack.c.bf16 %v741_v61, %v740_v60  ;;  %v1848_v60 = vld [vmem:[#allocation7 + $0xb0] sm:$0xff] }
 0x6ff   :  { %1679 = vmatmul.msk.bf16.vlgmr.msrb.gmra.mxu2 %vm119_vm0, %v744_v62  ;;  %v1890_v62 = vld [vmem:[#allocation9 + $0x8] ss:$0 sm:$0xff] }
 0x700   :  { %v735_v63 = vpop.f32.mrf.mxu1  ;;  %1010 = vmatpush.bf16.msra.mxu3 %v1848_v60 }
 0x701   :  { %v736_v0 = vadd.f32 %v1886_v56, %v735_v63 }
 0x703   :  { %v742_v3 = vmax.f32 %v736_v0, 0.0 }
 0x708   :  { %v737_v1 = vpop.f32.mrf.mxu1 }
 0x709   :  { %v738_v2 = vadd.f32 %v1886_v56, %v737_v1 }
 0x70b   :  { %v743_v4 = vmax.f32 %v738_v2, 0.0 }
 0x70d   :  { %v745_v5 = vpack.c.bf16 %v743_v4, %v742_v3 }
 0x70f   :  { %1680 = vmatmul.msk.bf16.gmra.mxu2 %vm119_vm0, %v745_v5 }
 0x782   :  { %v783_v10 = vpop.f32.mrf.mxu2 }
 0x783   :  { %v784_v12 = vadd.f32 %v1887_v11, %v783_v10 }
 0x785   :  { %v793_v15 = vmax.f32 %v784_v12, 0.0 }
 0x78a   :  { %v785_v13 = vpop.f32.mrf.mxu2 }
 0x78b   :  { %v786_v14 = vadd.f32 %v1887_v11, %v785_v13 }
 0x78d   :  { %v794_v16 = vmax.f32 %v786_v14, 0.0 }
 0x78f   :  { %v797_v17 = vpack.c.bf16 %v794_v16, %v793_v15 }
 0x791   :  { %1689 = vmatmul.msk.bf16.vlgmr.msrb.gmra.mxu3 %vm119_vm0, %v797_v17  ;;  %v1891_v17 = vld [vmem:[#allocation9 + $0x9] ss:$0 sm:$0xff] }
 0x792   :  { %v788_v18 = vpop.f32.mrf.mxu2 }
 0x793   :  { %v789_v19 = vadd.f32 %v1887_v11, %v788_v18 }
 0x795   :  { %v795_v22 = vmax.f32 %v789_v19, 0.0 }
 0x79a   :  { %v790_v20 = vpop.f32.mrf.mxu2 }
 0x79b   :  { %v791_v21 = vadd.f32 %v1887_v11, %v790_v20 }
 0x79d   :  { %v796_v23 = vmax.f32 %v791_v21, 0.0 }
 0x79f   :  { %v798_v24 = vpack.c.bf16 %v796_v23, %v795_v22 }
 0x7a1   :  { %1690 = vmatmul.msk.bf16.gmra.mxu3 %vm119_vm0, %v798_v24 }
 0x814   :  { %v836_v25 = vpop.f32.mrf.mxu3 }
 0x815   :  { %v837_v34 = vadd.f32 %v1888_v28, %v836_v25 }
 0x81c   :  { %v838_v26 = vpop.f32.mrf.mxu3 }
 0x81d   :  { %v839_v32 = vadd.f32 %v1888_v28, %v838_v26 }
 0x81f   :  { %v846_v35 = vpack.c.bf16 %v839_v32, %v837_v34  ;;  %v1852_v32 = vld [vmem:[#allocation7 + $0x120] sm:$0xff] }
 0x824   :  { %v841_v27 = vpop.f32.mrf.mxu3 }
 0x825   :  { %v842_v30 = vadd.f32 %v1888_v28, %v841_v27 }
 0x82c   :  { %v843_v29 = vpop.f32.mrf.mxu3 }
 0x82d   :  { %v844_v31 = vadd.f32 %v1888_v28, %v843_v29  ;;  %v1850_v29 = vld [vmem:[#allocation4 + $0x20] sm:$0xff] }
 0x82f   :  { %v847_v33 = vpack.c.bf16 %v844_v31, %v842_v30  ;;  %v1851_v30 = vld [vmem:[#allocation4 + $0x28] sm:$0xff] }
 0x830   :  { %v1853_v31 = vld [vmem:[#allocation7 + $0x128] sm:$0xff] }
 0x831   :  { %854 = vmatpush.bf16.msra.mxu0 %v847_v33  ;;  %1139 = vmatpush.bf16.msrb.mxu3 %v1853_v31  ;;  %v1029_v33 = vld [vmem:[#allocation6 + $0x4] sm:$0xf]  ;;  %v1858_v31 = vld [vmem:[#allocation7 + $0xc0] sm:$0xff] }
 0x835   :  { %855 = vmatpush.bf16.msra.mxu0 %v846_v35  ;;  %1140 = vmatpush.bf16.msrb.mxu3 %v1852_v32 }
 0x838   :  { %1691 = vmatmul.msk.bf16.vlgmr.msra.gmra.mxu0 %vm119_vm0, %v2082_v6 }
 0x848   :  { %1692 = vmatmul.msk.bf16.gmra.mxu0 %vm119_vm0, %v2086_v7 }
 0x8b5   :  { %v857_v36 = vpop.f32.mrf.mxu0 }
 0x8bd   :  { %v859_v37 = vpop.f32.mrf.mxu0 }
 0x8be   :  { %v867_v38 = vpack.c.bf16 %v859_v37, %v857_v36 }
 0x8c0   :  { %1701 = vmatmul.msk.bf16.vlgmr.msra.gmra.mxu1 %vm119_vm0, %v867_v38 }
 0x8c5   :  { %v862_v39 = vpop.f32.mrf.mxu0 }
 0x8cd   :  { %v864_v40 = vpop.f32.mrf.mxu0 }
 0x8ce   :  { %v868_v41 = vpack.c.bf16 %v864_v40, %v862_v39  ;;  %v650_v40 = vld [vmem:[#allocation6] sm:$0xf] }
 0x8d0   :  { %1702 = vmatmul.msk.bf16.gmra.mxu1 %vm119_vm0, %v868_v41  ;;  %v1855_v41 = vld [vmem:[#allocation7 + $0x138] sm:$0xff] }
 0x8e0   :  { %1724 = vmatmul.msk.bf16.vlgmr.msrb.gmra.mxu1 %vm119_vm0, %v650_v40 }
 0x93d   :  { %v906_v44 = vpop.f32.mrf.mxu1 }
 0x93e   :  { %v907_v46 = vadd.f32 %v1889_v45, %v906_v44 }
 0x940   :  { %v916_v49 = vmax.f32 %v907_v46, 0.0 }
 0x945   :  { %v908_v47 = vpop.f32.mrf.mxu1 }
 0x946   :  { %v909_v48 = vadd.f32 %v1889_v45, %v908_v47 }
 0x948   :  { %v917_v50 = vmax.f32 %v909_v48, 0.0 }
 0x94a   :  { %v920_v51 = vpack.c.bf16 %v917_v50, %v916_v49 }
 0x94c   :  { %1711 = vmatmul.msk.bf16.vlgmr.msra.gmra.mxu2 %vm119_vm0, %v920_v51 }
 0x94d   :  { %v911_v52 = vpop.f32.mrf.mxu1 }
 0x94e   :  { %v912_v53 = vadd.f32 %v1889_v45, %v911_v52 }
 0x950   :  { %v918_v56 = vmax.f32 %v912_v53, 0.0 }
 0x955   :  { %v913_v54 = vpop.f32.mrf.mxu1 }
 0x956   :  { %v914_v55 = vadd.f32 %v1889_v45, %v913_v54  ;;  %v1892_v45 = vld [vmem:[#allocation9 + $0x10] ss:$0 sm:$0xff] }
 0x958   :  { %v919_v57 = vmax.f32 %v914_v55, 0.0 }
 0x95a   :  { %v921_v58 = vpack.c.bf16 %v919_v57, %v918_v56 }
 0x95c   :  { %1712 = vmatmul.msk.bf16.gmra.mxu2 %vm119_vm0, %v921_v58 }
 0x9cf   :  { %v959_v61 = vpop.f32.mrf.mxu2 }
 0x9d0   :  { %v960_v63 = vadd.f32 %v1890_v62, %v959_v61  ;;  %v1059_v61 = vpop.f32.mrf.mxu1 }
 0x9d2   :  { %v969_v2 = vmax.f32 %v960_v63, 0.0 }
 0x9d7   :  { %v961_v0 = vpop.f32.mrf.mxu2 }
 0x9d8   :  { %v962_v1 = vadd.f32 %v1890_v62, %v961_v0  ;;  %v1061_v63 = vpop.f32.mrf.mxu1  ;;  %v1857_v0 = vld [vmem:[#allocation7 + $0x148] sm:$0xff] }
 0x9d9   :  { %1245 = vmatpush.bf16.msra.mxu1 %v1857_v0 }
 0x9da   :  { %v970_v3 = vmax.f32 %v962_v1, 0.0  ;;  %v1856_v1 = vld [vmem:[#allocation7 + $0x140] sm:$0xff] }
 0x9dc   :  { %v973_v4 = vpack.c.bf16 %v970_v3, %v969_v2  ;;  %v1893_v3 = vld [vmem:[#allocation9 + $0x11] ss:$0 sm:$0xff] }
 0x9dd   :  { %1246 = vmatpush.bf16.msra.mxu1 %v1856_v1 }
 0x9de   :  { %1721 = vmatmul.msk.bf16.vlgmr.msra.gmra.mxu3 %vm119_vm0, %v973_v4 }
 0x9df   :  { %v964_v5 = vpop.f32.mrf.mxu2 }
 0x9e0   :  { %v965_v8 = vadd.f32 %v1890_v62, %v964_v5 }
 0x9e2   :  { %v971_v11 = vmax.f32 %v965_v8, 0.0 }
 0x9e7   :  { %v966_v9 = vpop.f32.mrf.mxu2 }
 0x9e8   :  { %v967_v10 = vadd.f32 %v1890_v62, %v966_v9 }
 0x9ea   :  { %v972_v12 = vmax.f32 %v967_v10, 0.0 }
 0x9ec   :  { %v974_v13 = vpack.c.bf16 %v972_v12, %v971_v11 }
 0x9ee   :  { %1722 = vmatmul.msk.bf16.gmra.mxu3 %vm119_vm0, %v974_v13 }
 0xa61   :  { %v1012_v14 = vpop.f32.mrf.mxu3 }
 0xa62   :  { %v1013_v22 = vadd.f32 %v1891_v17, %v1012_v14 }
 0xa64   :  { %v1022_v27 = vmax.f32 %v1013_v22, 0.0  ;;  %v1894_v22 = vld [vmem:[#allocation9 + $0x12] ss:$0 sm:$0xff] }
 0xa69   :  { %v1014_v15 = vpop.f32.mrf.mxu3 }
 0xa6a   :  { %v1015_v20 = vadd.f32 %v1891_v17, %v1014_v15 }
 0xa6c   :  { %v1023_v25 = vmax.f32 %v1015_v20, 0.0 }
 0xa6e   :  { %v1026_v28 = vpack.c.bf16 %v1023_v25, %v1022_v27 }
 0xa71   :  { %v1017_v16 = vpop.f32.mrf.mxu3 }
 0xa72   :  { %v1018_v18 = vadd.f32 %v1891_v17, %v1017_v16 }
 0xa74   :  { %v1024_v23 = vmax.f32 %v1018_v18, 0.0 }
 0xa79   :  { %v1019_v19 = vpop.f32.mrf.mxu3 }
 0xa7a   :  { %v1020_v21 = vadd.f32 %v1891_v17, %v1019_v19 }
 0xa7c   :  { %v1025_v24 = vmax.f32 %v1020_v21, 0.0 }
 0xa7e   :  { %v1027_v26 = vpack.c.bf16 %v1025_v24, %v1024_v23 }
 0xa80   :  { %1039 = vmatpush.bf16.msrb.mxu0 %v1027_v26  ;;  %1090 = vmatpush.bf16.msrb.mxu2 %v1027_v26 }
 0xa84   :  { %1040 = vmatpush.bf16.msrb.mxu0 %v1026_v28  ;;  %1091 = vmatpush.bf16.msrb.mxu2 %v1026_v28 }
 0xa87   :  { %1733 = vmatmul.msk.bf16.vlgmr.msrb.gmra.mxu2 %vm119_vm0, %v1850_v29  ;;  %1723 = vmatmul.msk.bf16.vlgmr.msrb.gmra.mxu0 %vm119_vm0, %v1029_v33 }
 0xa88   :  { %1192 = vmatpush.bf16.msra.mxu0 %v1855_v41 }
 0xa8c   :  { %1193 = vmatpush.bf16.msra.mxu0 %v1854_v42 }
 0xa97   :  { %1734 = vmatmul.msk.bf16.gmra.mxu2 %vm119_vm0, %v1851_v30  ;;  %v1859_v30 = vld [vmem:[#allocation7 + $0xc8] sm:$0xff] }
 0xa98   :  { %1315 = vmatpush.bf16.msra.mxu3 %v1859_v30 }
 0xa9c   :  { %1316 = vmatpush.bf16.msra.mxu3 %v1858_v31 }
 0xb04   :  { %v1042_v43 = vpop.f32.mrf.mxu0 }
 0xb05   :  { %v1046_v60 = vmul.f32 0.7, %v1042_v43 }
 0xb07   :  { %v2142_v62 = vadd.f32 %v1059_v61, %v1046_v60 }
 0xb0a   :  { %v1093_v34 = vpop.f32.mrf.mxu2 }
 0xb0c   :  { %v1044_v47 = vpop.f32.mrf.mxu0 }
 0xb12   :  { %v1095_v35 = vpop.f32.mrf.mxu2 }
 0xb13   :  { %v1103_v36 = vpack.c.bf16 %v1095_v35, %v1093_v34 }
 0xb15   :  { %1743 = vmatmul.msk.bf16.vlgmr.msrb.gmra.mxu3 %vm119_vm0, %v1103_v36 }
 0xb1a   :  { %v1098_v37 = vpop.f32.mrf.mxu2 }
 0xb22   :  { %v1100_v38 = vpop.f32.mrf.mxu2 }
 0xb23   :  { %v1104_v39 = vpack.c.bf16 %v1100_v38, %v1098_v37  ;;  %v1861_v38 = vld [vmem:[#allocation7 + $0xd8] sm:$0xff] }
 0xb24   :  { %1368 = vmatpush.bf16.msrb.mxu0 %v1861_v38 }
 0xb25   :  { %1744 = vmatmul.msk.bf16.gmra.mxu3 %vm119_vm0, %v1104_v39 }
 0xb98   :  { %v1142_v44 = vpop.f32.mrf.mxu3 }
 0xb99   :  { %v1143_v46 = vadd.f32 %v1892_v45, %v1142_v44 }
 0xb9b   :  { %v1152_v50 = vmax.f32 %v1143_v46, 0.0 }
 0xba0   :  { %v1144_v48 = vpop.f32.mrf.mxu3 }
 0xba1   :  { %v1145_v49 = vadd.f32 %v1892_v45, %v1144_v48 }
 0xba3   :  { %v1153_v51 = vmax.f32 %v1145_v49, 0.0 }
 0xba5   :  { %v1156_v52 = vpack.c.bf16 %v1153_v51, %v1152_v50 }
 0xba7   :  { %1753 = vmatmul.msk.bf16.vlgmr.msra.gmra.mxu0 %vm119_vm0, %v1156_v52 }
 0xba8   :  { %v1147_v53 = vpop.f32.mrf.mxu3 }
 0xba9   :  { %v1148_v54 = vadd.f32 %v1892_v45, %v1147_v53  ;;  %v1863_v53 = vld [vmem:[#allocation7 + $0xe8] sm:$0xff] }
 0xbaa   :  { %1421 = vmatpush.bf16.msrb.mxu1 %v1863_v53 }
 0xbab   :  { %v1154_v57 = vmax.f32 %v1148_v54, 0.0  ;;  %v1862_v54 = vld [vmem:[#allocation7 + $0xe0] sm:$0xff] }
 0xbae   :  { %1422 = vmatpush.bf16.msrb.mxu1 %v1862_v54 }
 0xbb0   :  { %v1149_v55 = vpop.f32.mrf.mxu3 }
 0xbb1   :  { %v1150_v56 = vadd.f32 %v1892_v45, %v1149_v55 }
 0xbb3   :  { %v1155_v58 = vmax.f32 %v1150_v56, 0.0  ;;  %v1896_v56 = vld [vmem:[#allocation9 + $0xb] ss:$0 sm:$0xff] }
 0xbb5   :  { %v1157_v59 = vpack.c.bf16 %v1155_v58, %v1154_v57 }
 0xbb7   :  { %1754 = vmatmul.msk.bf16.gmra.mxu0 %vm119_vm0, %v1157_v59 }
 0xc24   :  { %v1195_v2 = vpop.f32.mrf.mxu0 }
 0xc25   :  { %v1196_v4 = vadd.f32 %v1893_v3, %v1195_v2 }
 0xc27   :  { %v1205_v9 = vmax.f32 %v1196_v4, 0.0 }
 0xc2c   :  { %v1197_v5 = vpop.f32.mrf.mxu0 }
 0xc2d   :  { %v1198_v8 = vadd.f32 %v1893_v3, %v1197_v5 }
 0xc2f   :  { %v1206_v10 = vmax.f32 %v1198_v8, 0.0 }
 0xc31   :  { %v1209_v11 = vpack.c.bf16 %v1206_v10, %v1205_v9 }
 0xc33   :  { %1763 = vmatmul.msk.bf16.vlgmr.msra.gmra.mxu1 %vm119_vm0, %v1209_v11 }
 0xc34   :  { %v1200_v12 = vpop.f32.mrf.mxu0 }
 0xc35   :  { %v1201_v13 = vadd.f32 %v1893_v3, %v1200_v12  ;;  %v1897_v12 = vld [vmem:[#allocation9 + $0xc] ss:$0 sm:$0xff] }
 0xc37   :  { %v1207_v16 = vmax.f32 %v1201_v13, 0.0 }
 0xc3c   :  { %v1202_v14 = vpop.f32.mrf.mxu0 }
 0xc3d   :  { %v1203_v15 = vadd.f32 %v1893_v3, %v1202_v14 }
 0xc3f   :  { %v1208_v17 = vmax.f32 %v1203_v15, 0.0 }
 0xc41   :  { %v1210_v18 = vpack.c.bf16 %v1208_v17, %v1207_v16 }
 0xc43   :  { %1764 = vmatmul.msk.bf16.gmra.mxu1 %vm119_vm0, %v1210_v18 }
 0xcb0   :  { %v1248_v19 = vpop.f32.mrf.mxu1 }
 0xcb1   :  { %v1249_v28 = vadd.f32 %v1894_v22, %v1248_v19 }
 0xcb8   :  { %v1250_v20 = vpop.f32.mrf.mxu1 }
 0xcb9   :  { %v1251_v26 = vadd.f32 %v1894_v22, %v1250_v20 }
 0xcbb   :  { %v1258_v29 = vpack.c.bf16 %v1251_v26, %v1249_v28  ;;  %v1864_v26 = vld [vmem:[#allocation7 + $0x150] sm:$0xff] }
 0xcc0   :  { %v1253_v21 = vpop.f32.mrf.mxu1 }
 0xcc1   :  { %v1254_v24 = vadd.f32 %v1894_v22, %v1253_v21 }
 0xcc8   :  { %v1255_v23 = vpop.f32.mrf.mxu1 }
 0xcc9   :  { %v1256_v25 = vadd.f32 %v1894_v22, %v1255_v23 }
 0xccb   :  { %v1259_v27 = vpack.c.bf16 %v1256_v25, %v1254_v24  ;;  %v1441_v24 = vld [vmem:[#allocation6 + $0x8] sm:$0xf] }
 0xccc   :  { %v1865_v25 = vld [vmem:[#allocation7 + $0x158] sm:$0xff] }
 0xccd   :  { %1266 = vmatpush.bf16.msra.mxu2 %v1259_v27  ;;  %1492 = vmatpush.bf16.msrb.mxu3 %v1865_v25 }
 0xcd1   :  { %1267 = vmatpush.bf16.msra.mxu2 %v1258_v29  ;;  %1493 = vmatpush.bf16.msrb.mxu3 %v1864_v26 }
 0xcd4   :  { %1765 = vmatmul.msk.bf16.vlgmr.msra.gmra.mxu2 %vm119_vm0, %v2082_v6  ;;  %v1860_v6 = vld [vmem:[#allocation7 + $0xd0] sm:$0xff] }
 0xcd5   :  { %1369 = vmatpush.bf16.msrb.mxu0 %v1860_v6 }
 0xce4   :  { %1766 = vmatmul.msk.bf16.gmra.mxu2 %vm119_vm0, %v2086_v7  ;;  %v1895_v7 = vld [vmem:[#allocation9 + $0xa] ss:$0 sm:$0xff] }
 0xd57   :  { %v1269_v32 = vpop.f32.mrf.mxu2 }
 0xd5f   :  { %v1271_v33 = vpop.f32.mrf.mxu2 }
 0xd60   :  { %v1279_v34 = vpack.c.bf16 %v1271_v33, %v1269_v32  ;;  %v1867_v32 = vld [vmem:[#allocation7 + $0x168] sm:$0xff]  ;;  %v1866_v33 = vld [vmem:[#allocation7 + $0x160] sm:$0xff] }
 0xd61   :  { %1532 = vmatpush.bf16.msra.mxu0 %v1867_v32 }
 0xd62   :  { %1775 = vmatmul.msk.bf16.vlgmr.msra.gmra.mxu3 %vm119_vm0, %v1279_v34  ;;  %v1898_v34 = vld [vmem:[#allocation9 + $0x13] ss:$0 sm:$0xff] }
 0xd65   :  { %1533 = vmatpush.bf16.msra.mxu0 %v1866_v33 }
 0xd67   :  { %v1274_v35 = vpop.f32.mrf.mxu2 }
 0xd6f   :  { %v1276_v36 = vpop.f32.mrf.mxu2 }
 0xd70   :  { %v1280_v37 = vpack.c.bf16 %v1276_v36, %v1274_v35 }
 0xd72   :  { %1776 = vmatmul.msk.bf16.gmra.mxu3 %vm119_vm0, %v1280_v37 }
 0xde5   :  { %v1318_v39 = vpop.f32.mrf.mxu3 }
 0xde6   :  { %v1319_v40 = vadd.f32 %v1895_v7, %v1318_v39  ;;  %v1899_v39 = vld [vmem:[#allocation9 + $0x14] ss:$0 sm:$0xff] }
 0xde8   :  { %v1328_v43 = vmax.f32 %v1319_v40, 0.0 }
 0xded   :  { %v1320_v41 = vpop.f32.mrf.mxu3 }
 0xdee   :  { %v1321_v42 = vadd.f32 %v1895_v7, %v1320_v41 }
 0xdf0   :  { %v1329_v44 = vmax.f32 %v1321_v42, 0.0 }
 0xdf2   :  { %v1332_v45 = vpack.c.bf16 %v1329_v44, %v1328_v43 }
 0xdf4   :  { %1785 = vmatmul.msk.bf16.vlgmr.msrb.gmra.mxu0 %vm119_vm0, %v1332_v45 }
 0xdf5   :  { %v1323_v46 = vpop.f32.mrf.mxu3 }
 0xdf6   :  { %v1324_v47 = vadd.f32 %v1895_v7, %v1323_v46 }
 0xdf8   :  { %v1330_v50 = vmax.f32 %v1324_v47, 0.0 }
 0xdfd   :  { %v1325_v48 = vpop.f32.mrf.mxu3 }
 0xdfe   :  { %v1326_v49 = vadd.f32 %v1895_v7, %v1325_v48 }
 0xe00   :  { %v1331_v51 = vmax.f32 %v1326_v49, 0.0 }
 0xe02   :  { %v1333_v52 = vpack.c.bf16 %v1331_v51, %v1330_v50 }
 0xe04   :  { %1786 = vmatmul.msk.bf16.gmra.mxu0 %vm119_vm0, %v1333_v52 }
 0xe71   :  { %v1371_v55 = vpop.f32.mrf.mxu0 }
 0xe72   :  { %v1372_v57 = vadd.f32 %v1896_v56, %v1371_v55 }
 0xe74   :  { %v1381_v60 = vmax.f32 %v1372_v57, 0.0 }
 0xe79   :  { %v1373_v58 = vpop.f32.mrf.mxu0 }
 0xe7a   :  { %v1374_v59 = vadd.f32 %v1896_v56, %v1373_v58 }
 0xe7c   :  { %v1382_v61 = vmax.f32 %v1374_v59, 0.0 }
 0xe7e   :  { %v1385_v63 = vpack.c.bf16 %v1382_v61, %v1381_v60 }
 0xe80   :  { %1795 = vmatmul.msk.bf16.vlgmr.msrb.gmra.mxu1 %vm119_vm0, %v1385_v63 }
 0xe81   :  { %v1376_v0 = vpop.f32.mrf.mxu0 }
 0xe82   :  { %v1377_v1 = vadd.f32 %v1896_v56, %v1376_v0 }
 0xe84   :  { %v1383_v4 = vmax.f32 %v1377_v1, 0.0 }
 0xe89   :  { %v1378_v2 = vpop.f32.mrf.mxu0 }
 0xe8a   :  { %v1379_v3 = vadd.f32 %v1896_v56, %v1378_v2 }
 0xe8c   :  { %v1384_v5 = vmax.f32 %v1379_v3, 0.0 }
 0xe8e   :  { %v1386_v8 = vpack.c.bf16 %v1384_v5, %v1383_v4 }
 0xe90   :  { %1796 = vmatmul.msk.bf16.gmra.mxu1 %vm119_vm0, %v1386_v8 }
 0xefd   :  { %v1424_v9 = vpop.f32.mrf.mxu1 }
 0xefe   :  { %v1425_v17 = vadd.f32 %v1897_v12, %v1424_v9 }
 0xf00   :  { %v1434_v22 = vmax.f32 %v1425_v17, 0.0 }
 0xf05   :  { %v1426_v10 = vpop.f32.mrf.mxu1 }
 0xf06   :  { %v1427_v15 = vadd.f32 %v1897_v12, %v1426_v10 }
 0xf08   :  { %v1435_v20 = vmax.f32 %v1427_v15, 0.0 }
 0xf0a   :  { %v1438_v23 = vpack.c.bf16 %v1435_v20, %v1434_v22 }
 0xf0d   :  { %v1429_v11 = vpop.f32.mrf.mxu1 }
 0xf0e   :  { %v1430_v13 = vadd.f32 %v1897_v12, %v1429_v11 }
 0xf10   :  { %v1436_v18 = vmax.f32 %v1430_v13, 0.0 }
 0xf15   :  { %v1431_v14 = vpop.f32.mrf.mxu1 }
 0xf16   :  { %v1432_v16 = vadd.f32 %v1897_v12, %v1431_v14 }
 0xf18   :  { %v1437_v19 = vmax.f32 %v1432_v16, 0.0 }
 0xf1a   :  { %v1439_v21 = vpack.c.bf16 %v1437_v19, %v1436_v18 }
 0xf1c   :  { %1451 = vmatpush.bf16.msrb.mxu2 %v1439_v21 }
 0xf20   :  { %1452 = vmatpush.bf16.msrb.mxu2 %v1438_v23 }
 0xf23   :  { %1797 = vmatmul.msk.bf16.vlgmr.msrb.gmra.mxu2 %vm119_vm0, %v1441_v24 }
 0xfa6   :  { %v1454_v27 = vpop.f32.mrf.mxu2 }
 0xfa7   :  { %v1458_v28 = vmul.f32 0.4, %v1454_v27 }
 0xfa9   :  { %v1459_v29 = vadd.f32 %v1458_v28, %v2142_v62 }
 0xfab   :  { %v1460_v30 = vpack.c.bf16 %v1459_v29, %v1459_v29 }
 0xfad   :  { %1806 = vmatmul.msk.bf16.vlgmr.msrb.gmra.mxu3 %vm119_vm0, %v1460_v30 }
 0xfae   :  { %v1456_v31 = vpop.f32.mrf.mxu2 }
0x1030   :  { %v1495_v35 = vpop.f32.mrf.mxu3 }
0x1031   :  { %v1496_v36 = vadd.f32 %v1898_v34, %v1495_v35 }
0x1033   :  { %v1499_v37 = vmax.f32 %v1496_v36, 0.0 }
0x1035   :  { %v1500_v38 = vpack.c.bf16 %v1499_v37, %v1499_v37 }
0x1037   :  { %1815 = vmatmul.msk.bf16.vlgmr.msra.gmra.mxu0 %vm119_vm0, %v1500_v38 }
0x1038   :  { %v1497_v6 = vpop.f32.mrf.mxu3 }
0x10b4   :  { %v1535_v7 = vpop.f32.mrf.mxu0 }
0x10b5   :  { %v1536_v40 = vadd.f32 %v1899_v39, %v1535_v7 }
0x10b7   :  { %1539 = vst.msk [vmem:[%s2169_s5] sm:$0xff] %vm119_vm0, %v1536_v40 }
0x10bc   :  { %v1537_v62 = vpop.f32.mrf.mxu0 }
0x10bd   :  { %1544 = vsyncpa [#allocation3], 1 }
0x10be   :  { %1545 = vsyncpa [#allocation5], 1 }
0x10bf   :  { %1546 = vsyncpa [#allocation8], 1 }

</bundles_post_ra>
